<compile_context>
chip_gen: v7x
topology: tpu7x:2x2x1
jax: 0.10.0
libtpu: 0.0.40
codegen_flags: <defaults>
</compile_context>

<pallas_src>
import functools
import math

import jax
import jax.numpy as jnp
from jax.experimental import pallas as pl
from jax.experimental.pallas import tpu as pltpu


def _temporal_block_kernel(
    # inputs
    x_q_ref, x_kv_ref,
    wq_ref, bq_ref, wk_ref, bk_ref, wv_ref, bv_ref, wo_ref, bo_ref,
    g1_ref, be1_ref,
    w1_ref, bf1_ref, w2_ref, bf2_ref,
    g2_ref, be2_ref,
    # outputs
    out_ref, attn_ref,
    # scratch: head-major bf16 K/V, computed once per batch
    kh_ref, vh_ref,
    *, num_heads: int, d_k: int,
):
    tq = x_q_ref.shape[1]
    s_kv = x_kv_ref.shape[1]
    d_model = x_q_ref.shape[2]

    # --- K/V projections + head-major relayout: ONCE per batch -------------
    # (inner query-tile grid axis is "arbitrary", so this fires only for the
    #  first query tile of each batch element)
    @pl.when(pl.program_id(1) == 0)
    def _():
        x_kv = x_kv_ref[0]                                    # (S, D) bf16
        k = jnp.dot(x_kv, wk_ref[...],
                    preferred_element_type=jnp.float32) + bk_ref[...]
        v = jnp.dot(x_kv, wv_ref[...],
                    preferred_element_type=jnp.float32) + bv_ref[...]
        kh_ref[...] = jnp.transpose(
            k.reshape(s_kv, num_heads, d_k), (1, 0, 2)).astype(jnp.bfloat16)
        vh_ref[...] = jnp.transpose(
            v.reshape(s_kv, num_heads, d_k), (1, 0, 2)).astype(jnp.bfloat16)

    x_q_f32 = x_q_ref[0].astype(jnp.float32)                  # (tq, D) residual
    x_q_bf = x_q_f32.astype(jnp.bfloat16)

    # --- Q projection (1/sqrt(d_k) already folded into wq/bq by wrapper) ---
    q = jnp.dot(x_q_bf, wq_ref[...],
                preferred_element_type=jnp.float32) + bq_ref[...]
    qh = jnp.transpose(q.reshape(tq, num_heads, d_k), (1, 0, 2))  # (H,tq,d_k)

    # --- batched scaled-dot-product attention over all heads at once -------
    s = jnp.einsum("hqd,hkd->hqk", qh.astype(jnp.bfloat16), kh_ref[...],
                   preferred_element_type=jnp.float32)         # (H, tq, S)
    s = s - jnp.max(s, axis=-1, keepdims=True)
    e = jnp.exp(s)
    a = e * pl.reciprocal(jnp.sum(e, axis=-1, keepdims=True), approx=True)
    attn_ref[0] = a.astype(attn_ref.dtype)                     # one store

    ctx = jnp.einsum("hqk,hkd->hqd", a.astype(jnp.bfloat16), vh_ref[...],
                     preferred_element_type=jnp.float32)        # (H, tq, d_k)
    ctx = jnp.transpose(ctx, (1, 0, 2)).reshape(tq, d_model)    # (tq, D)

    # --- single full-width output projection --------------------------------
    attn_out = jnp.dot(ctx.astype(jnp.bfloat16), wo_ref[...],
                       preferred_element_type=jnp.float32) + bo_ref[...]

    # --- residual + LayerNorm 1 (f32; dropout == identity at inference) ----
    h1 = x_q_f32 + attn_out
    mu1 = jnp.mean(h1, axis=-1, keepdims=True)
    var1 = jnp.mean((h1 - mu1) ** 2, axis=-1, keepdims=True)
    h1n = (h1 - mu1) * jax.lax.rsqrt(var1 + 1e-5) * g1_ref[...] + be1_ref[...]

    # --- FFN: Linear -> ReLU -> Linear (bf16 operands, f32 acc) ------------
    f = jnp.dot(h1n.astype(jnp.bfloat16), w1_ref[...],
                preferred_element_type=jnp.float32) + bf1_ref[...]
    f = jnp.maximum(f, 0.0)
    ffn = jnp.dot(f.astype(jnp.bfloat16), w2_ref[...],
                  preferred_element_type=jnp.float32) + bf2_ref[...]

    # --- residual + LayerNorm 2 --------------------------------------------
    h2 = h1n + ffn
    mu2 = jnp.mean(h2, axis=-1, keepdims=True)
    var2 = jnp.mean((h2 - mu2) ** 2, axis=-1, keepdims=True)
    out = (h2 - mu2) * jax.lax.rsqrt(var2 + 1e-5) * g2_ref[...] + be2_ref[...]

    out_ref[0] = out.astype(out_ref.dtype)


def _pick_vmem_limit_bytes():
    """~75% of physical VMEM, capped at 100 MiB; None -> compiler default."""
    try:
        cap = getattr(pltpu.get_tpu_info(), "vmem_capacity_bytes", None)
        if cap:
            return min(int(cap) * 3 // 4, 100 * 1024 * 1024)
    except Exception:
        pass
    return None


def temporal_attention_block(x, params, *, num_heads: int, q_tile=None,
                             attn_dtype=jnp.bfloat16):
    """x: (B, S, D) float32. Returns (out (B,S,D), attn (B,H,S,S))."""
    B, S, D = x.shape
    assert D % num_heads == 0
    d_k = D // num_heads

    # Query-tile grid axis bounds per-step VMEM at large S.
    if q_tile is None:
        q_tile = 128 if (S > 128 and S % 128 == 0) else S
    assert S % q_tile == 0 and (q_tile == S or q_tile % 8 == 0)
    n_q = S // q_tile

    # Fold the 1/sqrt(d_k) attention scale into the query projection (f32,
    # before the bf16 cast) so the kernel never multiplies the score tensor.
    scale = 1.0 / math.sqrt(d_k)
    wq = params["wq"] * scale
    bq = params["bq"] * scale

    # Weight matrices pre-cast to bf16 (MXU operands); biases / LN params
    # stay f32 (applied in the f32 accumulation path).
    bf = lambda w: w.astype(jnp.bfloat16)
    weight_args = [
        bf(wq), bq, bf(params["wk"]), params["bk"],
        bf(params["wv"]), params["bv"], bf(params["wo"]), params["bo"],
        params["g1"], params["be1"],
        bf(params["w1"]), params["bf1"], bf(params["w2"]), params["bf2"],
        params["g2"], params["be2"],
    ]

    # Grid-invariant operands: single-buffered (they never change).
    def rep_spec(arr):
        nd = arr.ndim
        return pl.BlockSpec(arr.shape, lambda b, qi, _nd=nd: (0,) * _nd,
                            pipeline_mode=pl.Buffered(1))

    kernel = functools.partial(_temporal_block_kernel,
                               num_heads=num_heads, d_k=d_k)

    x_kv = x.astype(jnp.bfloat16)   # K/V input: bf16 halves its DMA + VMEM

    cp_kwargs = dict(dimension_semantics=("parallel", "arbitrary"))
    vmem_limit = _pick_vmem_limit_bytes()
    if vmem_limit is not None:
        cp_kwargs["vmem_limit_bytes"] = vmem_limit

    out, attn = pl.pallas_call(
        kernel,
        out_shape=(
            jax.ShapeDtypeStruct((B, S, D), x.dtype),
            jax.ShapeDtypeStruct((B, num_heads, S, S), attn_dtype),
        ),
        grid_spec=pltpu.PrefetchScalarGridSpec(
            num_scalar_prefetch=0,
            grid=(B, n_q),
            in_specs=[
                pl.BlockSpec((1, q_tile, D), lambda b, qi: (b, qi, 0)),  # query rows (f32)
                pl.BlockSpec((1, S, D), lambda b, qi: (b, 0, 0)),        # full seq (bf16)
            ] + [rep_spec(w) for w in weight_args],
            out_specs=[
                pl.BlockSpec((1, q_tile, D), lambda b, qi: (b, qi, 0)),
                pl.BlockSpec((1, num_heads, q_tile, S),
                             lambda b, qi: (b, 0, qi, 0)),
            ],
            scratch_shapes=[
                pltpu.VMEM((num_heads, S, d_k), jnp.bfloat16),   # K head-major
                pltpu.VMEM((num_heads, S, d_k), jnp.bfloat16),   # V head-major
            ],
        ),
        compiler_params=pltpu.CompilerParams(**cp_kwargs),
    )(x, x_kv, *weight_args)
    return out, attn


def _init_params(key, d_model, num_heads, dim_feedforward):
    """Deterministic synthetic params. Linear weights are stored transposed
    relative to PyTorch (i.e. (in, out)), so the kernel computes x @ W + b,
    matching nn.Linear's x @ W_pt.T + b."""
    ks = jax.random.split(key, 12)
    scale = 0.1
    return {
        "wq": scale * jax.random.normal(ks[0], (d_model, d_model), jnp.float32),
        "wk": scale * jax.random.normal(ks[1], (d_model, d_model), jnp.float32),
        "wv": scale * jax.random.normal(ks[2], (d_model, d_model), jnp.float32),
        "wo": scale * jax.random.normal(ks[3], (d_model, d_model), jnp.float32),
        "bq": scale * jax.random.normal(ks[4], (1, d_model), jnp.float32),
        "bk": scale * jax.random.normal(ks[5], (1, d_model), jnp.float32),
        "bv": scale * jax.random.normal(ks[6], (1, d_model), jnp.float32),
        "bo": scale * jax.random.normal(ks[7], (1, d_model), jnp.float32),
        "g1": jnp.ones((1, d_model), jnp.float32),
        "be1": jnp.zeros((1, d_model), jnp.float32),
        "w1": scale * jax.random.normal(ks[8], (d_model, dim_feedforward), jnp.float32),
        "bf1": scale * jax.random.normal(ks[9], (1, dim_feedforward), jnp.float32),
        "w2": scale * jax.random.normal(ks[10], (dim_feedforward, d_model), jnp.float32),
        "bf2": scale * jax.random.normal(ks[11], (1, d_model), jnp.float32),
        "g2": jnp.ones((1, d_model), jnp.float32),
        "be2": jnp.zeros((1, d_model), jnp.float32),
    }


def _reference(x, p, num_heads):
    """Pure-JAX f32 reference mirroring the PyTorch forward (dropout = identity)."""
    B, S, D = x.shape
    d_k = D // num_heads

    def ln(h, g, b):
        mu = jnp.mean(h, -1, keepdims=True)
        var = jnp.mean((h - mu) ** 2, -1, keepdims=True)
        return (h - mu) / jnp.sqrt(var + 1e-5) * g + b

    q = x @ p["wq"] + p["bq"]
    k = x @ p["wk"] + p["bk"]
    v = x @ p["wv"] + p["bv"]
    qh = q.reshape(B, S, num_heads, d_k).transpose(0, 2, 1, 3)
    kh = k.reshape(B, S, num_heads, d_k).transpose(0, 2, 1, 3)
    vh = v.reshape(B, S, num_heads, d_k).transpose(0, 2, 1, 3)
    scores = jnp.einsum("bhqd,bhkd->bhqk", qh, kh) / jnp.sqrt(jnp.float32(d_k))
    attn = jax.nn.softmax(scores, axis=-1)
    ctx = jnp.einsum("bhqk,bhkd->bhqd", attn, vh)
    ctx = ctx.transpose(0, 2, 1, 3).reshape(B, S, D)
    attn_out = ctx @ p["wo"] + p["bo"]
    h1 = ln(x + attn_out, p["g1"], p["be1"])
    ffn = jnp.maximum(h1 @ p["w1"] + p["bf1"], 0.0) @ p["w2"] + p["bf2"]
    h2 = ln(h1 + ffn, p["g2"], p["be2"])
    return h2, attn


if __name__ == "__main__":
    B, S, D = 2, 8, 32
    NUM_HEADS = 4
    DIM_FF = 64  # small synthetic size (module default is 2048)
    # TODO(synk): dropout is modeled as identity (inference mode).

    key = jax.random.PRNGKey(0)
    kx, kp = jax.random.split(key)
    x = jax.random.normal(kx, (B, S, D), jnp.float32)
    params = _init_params(kp, D, NUM_HEADS, DIM_FF)

    out, attn = temporal_attention_block(x, params, num_heads=NUM_HEADS)
    out = jax.block_until_ready(out)
    attn = jax.block_until_ready(attn)

    ref_out, ref_attn = _reference(x, params, NUM_HEADS)
    assert out.shape == (B, S, D) and attn.shape == (B, NUM_HEADS, S, S)
    # Kernel uses bf16 MXU operands (f32 accumulation), the EUP approximate
    # reciprocal for the softmax denominator, and writes attention
    # probabilities in bf16 — compare to the f32 reference at mixed-precision
    # tolerance (attn probs therefore do not sum to exactly 1).
    assert jnp.allclose(out, ref_out, atol=3e-2, rtol=3e-2)
    assert jnp.allclose(attn.astype(jnp.float32), ref_attn, atol=2e-2, rtol=5e-2)
    print("KERNEL_OK")
</pallas_src>

<mosaic_0001>
module attributes {stable_mosaic.version = 11 : i64} {
  func.func @_temporal_block_kernel(%arg0: i32, %arg1: i32, %arg2: memref<1x8x32xf32, #tpu.memory_space<vmem>>, %arg3: memref<1x8x32xbf16, #tpu.memory_space<vmem>>, %arg4: memref<32x32xbf16, #tpu.memory_space<vmem>>, %arg5: memref<1x32xf32, #tpu.memory_space<vmem>>, %arg6: memref<32x32xbf16, #tpu.memory_space<vmem>>, %arg7: memref<1x32xf32, #tpu.memory_space<vmem>>, %arg8: memref<32x32xbf16, #tpu.memory_space<vmem>>, %arg9: memref<1x32xf32, #tpu.memory_space<vmem>>, %arg10: memref<32x32xbf16, #tpu.memory_space<vmem>>, %arg11: memref<1x32xf32, #tpu.memory_space<vmem>>, %arg12: memref<1x32xf32, #tpu.memory_space<vmem>>, %arg13: memref<1x32xf32, #tpu.memory_space<vmem>>, %arg14: memref<32x64xbf16, #tpu.memory_space<vmem>>, %arg15: memref<1x64xf32, #tpu.memory_space<vmem>>, %arg16: memref<64x32xbf16, #tpu.memory_space<vmem>>, %arg17: memref<1x32xf32, #tpu.memory_space<vmem>>, %arg18: memref<1x32xf32, #tpu.memory_space<vmem>>, %arg19: memref<1x32xf32, #tpu.memory_space<vmem>>, %arg20: memref<1x8x32xf32, #tpu.memory_space<vmem>>, %arg21: memref<1x4x8x8xbf16, #tpu.memory_space<vmem>>, %arg22: memref<4x8x8xbf16, #tpu.memory_space<vmem>>, %arg23: memref<4x8x8xbf16, #tpu.memory_space<vmem>>) attributes {dimension_semantics = [#tpu.dimension_semantics<parallel>, #tpu.dimension_semantics<arbitrary>], iteration_bounds = array<i64: 2, 1>, scalar_prefetch = 0 : i64, scratch_operands = 2 : i64, tpu.core_type = #tpu.core_type<tc>, window_params = [{transform_indices = @transform_0, window_bounds = array<i64: 1, 8, 32>}, {transform_indices = @transform_1, window_bounds = array<i64: 1, 8, 32>}, {pipeline_mode = #tpu.pipeline_mode<synchronous>, transform_indices = @transform_2, window_bounds = array<i64: 32, 32>}, {pipeline_mode = #tpu.pipeline_mode<synchronous>, transform_indices = @transform_3, window_bounds = array<i64: 1, 32>}, {pipeline_mode = #tpu.pipeline_mode<synchronous>, transform_indices = @transform_4, window_bounds = array<i64: 32, 32>}, {pipeline_mode = #tpu.pipeline_mode<synchronous>, transform_indices = @transform_5, window_bounds = array<i64: 1, 32>}, {pipeline_mode = #tpu.pipeline_mode<synchronous>, transform_indices = @transform_6, window_bounds = array<i64: 32, 32>}, {pipeline_mode = #tpu.pipeline_mode<synchronous>, transform_indices = @transform_7, window_bounds = array<i64: 1, 32>}, {pipeline_mode = #tpu.pipeline_mode<synchronous>, transform_indices = @transform_8, window_bounds = array<i64: 32, 32>}, {pipeline_mode = #tpu.pipeline_mode<synchronous>, transform_indices = @transform_9, window_bounds = array<i64: 1, 32>}, {pipeline_mode = #tpu.pipeline_mode<synchronous>, transform_indices = @transform_10, window_bounds = array<i64: 1, 32>}, {pipeline_mode = #tpu.pipeline_mode<synchronous>, transform_indices = @transform_11, window_bounds = array<i64: 1, 32>}, {pipeline_mode = #tpu.pipeline_mode<synchronous>, transform_indices = @transform_12, window_bounds = array<i64: 32, 64>}, {pipeline_mode = #tpu.pipeline_mode<synchronous>, transform_indices = @transform_13, window_bounds = array<i64: 1, 64>}, {pipeline_mode = #tpu.pipeline_mode<synchronous>, transform_indices = @transform_14, window_bounds = array<i64: 64, 32>}, {pipeline_mode = #tpu.pipeline_mode<synchronous>, transform_indices = @transform_15, window_bounds = array<i64: 1, 32>}, {pipeline_mode = #tpu.pipeline_mode<synchronous>, transform_indices = @transform_16, window_bounds = array<i64: 1, 32>}, {pipeline_mode = #tpu.pipeline_mode<synchronous>, transform_indices = @transform_17, window_bounds = array<i64: 1, 32>}, {transform_indices = @transform_18, window_bounds = array<i64: 1, 8, 32>}, {transform_indices = @transform_19, window_bounds = array<i64: 1, 4, 8, 8>}]} {
    %c0_i32 = arith.constant 0 : i32
    %0 = arith.cmpi eq, %arg1, %c0_i32 : i32
    %1 = arith.extui %0 : i1 to i32
    %c0_i32_0 = arith.constant 0 : i32
    %2 = arith.cmpi ne, %1, %c0_i32_0 : i32
    scf.if %2 {
      %c0_58 = arith.constant 0 : index
      %c0_59 = arith.constant 0 : index
      %c0_60 = arith.constant 0 : index
      %108 = vector.load %arg3[%c0_58, %c0_59, %c0_60] : memref<1x8x32xbf16, #tpu.memory_space<vmem>>, vector<1x8x32xbf16>
      %109 = vector.shape_cast %108 : vector<1x8x32xbf16> to vector<8x32xbf16>
      %c0_61 = arith.constant 0 : index
      %c0_62 = arith.constant 0 : index
      %110 = vector.load %arg6[%c0_61, %c0_62] : memref<32x32xbf16, #tpu.memory_space<vmem>>, vector<32x32xbf16>
      %cst_63 = arith.constant dense<0.000000e+00> : vector<8x32xf32>
      %111 = tpu.matmul %109, %110, %cst_63 {dimension_numbers = #tpu.dot_dimension_numbers<[1], [0], [0], [1], [0, 0, 1, 1], [], []>} : vector<8x32xbf16>, vector<32x32xbf16>, vector<8x32xf32> -> vector<8x32xf32>
      %c0_64 = arith.constant 0 : index
      %c0_65 = arith.constant 0 : index
      %112 = vector.load %arg7[%c0_64, %c0_65] : memref<1x32xf32, #tpu.memory_space<vmem>>, vector<1x32xf32>
      %113 = vector.broadcast %112 : vector<1x32xf32> to vector<8x32xf32>
      %114 = arith.addf %111, %113 : vector<8x32xf32>
      %c0_66 = arith.constant 0 : index
      %c0_67 = arith.constant 0 : index
      %115 = vector.load %arg8[%c0_66, %c0_67] : memref<32x32xbf16, #tpu.memory_space<vmem>>, vector<32x32xbf16>
      %cst_68 = arith.constant dense<0.000000e+00> : vector<8x32xf32>
      %116 = tpu.matmul %109, %115, %cst_68 {dimension_numbers = #tpu.dot_dimension_numbers<[1], [0], [0], [1], [0, 0, 1, 1], [], []>} : vector<8x32xbf16>, vector<32x32xbf16>, vector<8x32xf32> -> vector<8x32xf32>
      %c0_69 = arith.constant 0 : index
      %c0_70 = arith.constant 0 : index
      %117 = vector.load %arg9[%c0_69, %c0_70] : memref<1x32xf32, #tpu.memory_space<vmem>>, vector<1x32xf32>
      %118 = vector.broadcast %117 : vector<1x32xf32> to vector<8x32xf32>
      %119 = arith.addf %116, %118 : vector<8x32xf32>
      %120 = vector.shape_cast %114 : vector<8x32xf32> to vector<8x4x8xf32>
      %121 = tpu.transpose %120, [1, 0, 2] : vector<8x4x8xf32> -> vector<4x8x8xf32>
      %122 = arith.truncf %121 : vector<4x8x8xf32> to vector<4x8x8xbf16>
      %c0_71 = arith.constant 0 : index
      %c0_72 = arith.constant 0 : index
      %c0_73 = arith.constant 0 : index
      %123 = vector.load %arg22[%c0_71, %c0_72, %c0_73] : memref<4x8x8xbf16, #tpu.memory_space<vmem>>, vector<4x8x8xbf16>
      tpu.vector_store %arg22[%c0_71, %c0_72, %c0_73], %122 {strides = array<i32>} : memref<4x8x8xbf16, #tpu.memory_space<vmem>>, vector<4x8x8xbf16>,
      %124 = vector.shape_cast %119 : vector<8x32xf32> to vector<8x4x8xf32>
      %125 = tpu.transpose %124, [1, 0, 2] : vector<8x4x8xf32> -> vector<4x8x8xf32>
      %126 = arith.truncf %125 : vector<4x8x8xf32> to vector<4x8x8xbf16>
      %c0_74 = arith.constant 0 : index
      %c0_75 = arith.constant 0 : index
      %c0_76 = arith.constant 0 : index
      %127 = vector.load %arg23[%c0_74, %c0_75, %c0_76] : memref<4x8x8xbf16, #tpu.memory_space<vmem>>, vector<4x8x8xbf16>
      tpu.vector_store %arg23[%c0_74, %c0_75, %c0_76], %126 {strides = array<i32>} : memref<4x8x8xbf16, #tpu.memory_space<vmem>>, vector<4x8x8xbf16>,
    } else {
    }
    %c0 = arith.constant 0 : index
    %c0_1 = arith.constant 0 : index
    %c0_2 = arith.constant 0 : index
    %3 = vector.load %arg2[%c0, %c0_1, %c0_2] : memref<1x8x32xf32, #tpu.memory_space<vmem>>, vector<1x8x32xf32>
    %4 = vector.shape_cast %3 : vector<1x8x32xf32> to vector<8x32xf32>
    %5 = arith.truncf %4 : vector<8x32xf32> to vector<8x32xbf16>
    %c0_3 = arith.constant 0 : index
    %c0_4 = arith.constant 0 : index
    %6 = vector.load %arg4[%c0_3, %c0_4] : memref<32x32xbf16, #tpu.memory_space<vmem>>, vector<32x32xbf16>
    %cst = arith.constant dense<0.000000e+00> : vector<8x32xf32>
    %7 = tpu.matmul %5, %6, %cst {dimension_numbers = #tpu.dot_dimension_numbers<[1], [0], [0], [1], [0, 0, 1, 1], [], []>} : vector<8x32xbf16>, vector<32x32xbf16>, vector<8x32xf32> -> vector<8x32xf32>
    %c0_5 = arith.constant 0 : index
    %c0_6 = arith.constant 0 : index
    %8 = vector.load %arg5[%c0_5, %c0_6] : memref<1x32xf32, #tpu.memory_space<vmem>>, vector<1x32xf32>
    %9 = vector.broadcast %8 : vector<1x32xf32> to vector<8x32xf32>
    %10 = arith.addf %7, %9 : vector<8x32xf32>
    %11 = vector.shape_cast %10 : vector<8x32xf32> to vector<8x4x8xf32>
    %12 = tpu.transpose %11, [1, 0, 2] : vector<8x4x8xf32> -> vector<4x8x8xf32>
    %13 = arith.truncf %12 : vector<4x8x8xf32> to vector<4x8x8xbf16>
    %c0_7 = arith.constant 0 : index
    %c0_8 = arith.constant 0 : index
    %c0_9 = arith.constant 0 : index
    %14 = vector.load %arg22[%c0_7, %c0_8, %c0_9] : memref<4x8x8xbf16, #tpu.memory_space<vmem>>, vector<4x8x8xbf16>
    "tpu.trace_start"() <{level = 10 : i32, message = "hqd,hkd->hqk"}> : () -> ()
    %cst_10 = arith.constant dense<0.000000e+00> : vector<4x8x8xf32>
    %15 = tpu.matmul %13, %14, %cst_10 {dimension_numbers = #tpu.dot_dimension_numbers<[2], [2], [1], [1], [0, 0, 0, 1, 1, 1], [0], [0]>} : vector<4x8x8xbf16>, vector<4x8x8xbf16>, vector<4x8x8xf32> -> vector<4x8x8xf32>
    "tpu.trace_stop"() : () -> ()
    %cst_11 = arith.constant dense<0xFF800000> : vector<4x8xf32>
    %16 = vector.multi_reduction <maximumf>, %15, %cst_11 [2] : vector<4x8x8xf32> to vector<4x8xf32>
    %17 = vector.shape_cast %16 : vector<4x8xf32> to vector<4x8x1xf32>
    %18 = vector.broadcast %17 : vector<4x8x1xf32> to vector<4x8x8xf32>
    %19 = arith.subf %15, %18 : vector<4x8x8xf32>
    %20 = math.exp %19 : vector<4x8x8xf32>
    %cst_12 = arith.constant dense<0.000000e+00> : vector<4x8xf32>
    %21 = vector.multi_reduction <add>, %20, %cst_12 [2] : vector<4x8x8xf32> to vector<4x8xf32>
    %22 = vector.shape_cast %21 : vector<4x8xf32> to vector<4x8x1xf32>
    %23 = tpu.reciprocal %22 {approx = true} : vector<4x8x1xf32> -> vector<4x8x1xf32>
    %24 = vector.broadcast %23 : vector<4x8x1xf32> to vector<4x8x8xf32>
    %25 = arith.mulf %20, %24 : vector<4x8x8xf32>
    %26 = arith.truncf %25 : vector<4x8x8xf32> to vector<4x8x8xbf16>
    %c0_13 = arith.constant 0 : index
    %c0_14 = arith.constant 0 : index
    %c0_15 = arith.constant 0 : index
    %c0_16 = arith.constant 0 : index
    %27 = vector.load %arg21[%c0_13, %c0_14, %c0_15, %c0_16] : memref<1x4x8x8xbf16, #tpu.memory_space<vmem>>, vector<1x4x8x8xbf16>
    %28 = vector.shape_cast %27 : vector<1x4x8x8xbf16> to vector<4x8x8xbf16>
    %29 = vector.shape_cast %26 : vector<4x8x8xbf16> to vector<1x4x8x8xbf16>
    tpu.vector_store %arg21[%c0_13, %c0_14, %c0_15, %c0_16], %29 {strides = array<i32>} : memref<1x4x8x8xbf16, #tpu.memory_space<vmem>>, vector<1x4x8x8xbf16>,
    %30 = arith.truncf %25 : vector<4x8x8xf32> to vector<4x8x8xbf16>
    %c0_17 = arith.constant 0 : index
    %c0_18 = arith.constant 0 : index
    %c0_19 = arith.constant 0 : index
    %31 = vector.load %arg23[%c0_17, %c0_18, %c0_19] : memref<4x8x8xbf16, #tpu.memory_space<vmem>>, vector<4x8x8xbf16>
    "tpu.trace_start"() <{level = 10 : i32, message = "hqk,hkd->hqd"}> : () -> ()
    %cst_20 = arith.constant dense<0.000000e+00> : vector<4x8x8xf32>
    %32 = tpu.matmul %30, %31, %cst_20 {dimension_numbers = #tpu.dot_dimension_numbers<[2], [1], [1], [2], [0, 0, 0, 1, 1, 2], [0], [0]>} : vector<4x8x8xbf16>, vector<4x8x8xbf16>, vector<4x8x8xf32> -> vector<4x8x8xf32>
    "tpu.trace_stop"() : () -> ()
    %33 = tpu.transpose %32, [1, 0, 2] : vector<4x8x8xf32> -> vector<8x4x8xf32>
    %34 = vector.shape_cast %33 : vector<8x4x8xf32> to vector<8x32xf32>
    %35 = arith.truncf %34 : vector<8x32xf32> to vector<8x32xbf16>
    %c0_21 = arith.constant 0 : index
    %c0_22 = arith.constant 0 : index
    %36 = vector.load %arg10[%c0_21, %c0_22] : memref<32x32xbf16, #tpu.memory_space<vmem>>, vector<32x32xbf16>
    %cst_23 = arith.constant dense<0.000000e+00> : vector<8x32xf32>
    %37 = tpu.matmul %35, %36, %cst_23 {dimension_numbers = #tpu.dot_dimension_numbers<[1], [0], [0], [1], [0, 0, 1, 1], [], []>} : vector<8x32xbf16>, vector<32x32xbf16>, vector<8x32xf32> -> vector<8x32xf32>
    %c0_24 = arith.constant 0 : index
    %c0_25 = arith.constant 0 : index
    %38 = vector.load %arg11[%c0_24, %c0_25] : memref<1x32xf32, #tpu.memory_space<vmem>>, vector<1x32xf32>
    %39 = vector.broadcast %38 : vector<1x32xf32> to vector<8x32xf32>
    %40 = arith.addf %37, %39 : vector<8x32xf32>
    %41 = arith.addf %4, %40 : vector<8x32xf32>
    %cst_26 = arith.constant dense<0.000000e+00> : vector<8xf32>
    %42 = vector.multi_reduction <add>, %41, %cst_26 [1] : vector<8x32xf32> to vector<8xf32>
    %43 = vector.shape_cast %42 : vector<8xf32> to vector<8x1xf32>
    %cst_27 = arith.constant 3.200000e+01 : f32
    %44 = vector.broadcast %cst_27 : f32 to vector<8x1xf32>
    %45 = arith.divf %43, %44 : vector<8x1xf32>
    %46 = vector.broadcast %45 : vector<8x1xf32> to vector<8x32xf32>
    %47 = arith.subf %41, %46 : vector<8x32xf32>
    %48 = arith.mulf %47, %47 : vector<8x32xf32>
    %cst_28 = arith.constant dense<0.000000e+00> : vector<8xf32>
    %49 = vector.multi_reduction <add>, %48, %cst_28 [1] : vector<8x32xf32> to vector<8xf32>
    %50 = vector.shape_cast %49 : vector<8xf32> to vector<8x1xf32>
    %cst_29 = arith.constant 3.200000e+01 : f32
    %51 = vector.broadcast %cst_29 : f32 to vector<8x1xf32>
    %52 = arith.divf %50, %51 : vector<8x1xf32>
    %53 = vector.broadcast %45 : vector<8x1xf32> to vector<8x32xf32>
    %54 = arith.subf %41, %53 : vector<8x32xf32>
    %cst_30 = arith.constant 9.99999974E-6 : f32
    %55 = vector.broadcast %cst_30 : f32 to vector<8x1xf32>
    %56 = arith.addf %52, %55 : vector<8x1xf32>
    %57 = math.rsqrt %56 : vector<8x1xf32>
    %58 = vector.broadcast %57 : vector<8x1xf32> to vector<8x32xf32>
    %59 = arith.mulf %54, %58 : vector<8x32xf32>
    %c0_31 = arith.constant 0 : index
    %c0_32 = arith.constant 0 : index
    %60 = vector.load %arg12[%c0_31, %c0_32] : memref<1x32xf32, #tpu.memory_space<vmem>>, vector<1x32xf32>
    %61 = vector.broadcast %60 : vector<1x32xf32> to vector<8x32xf32>
    %62 = arith.mulf %59, %61 : vector<8x32xf32>
    %c0_33 = arith.constant 0 : index
    %c0_34 = arith.constant 0 : index
    %63 = vector.load %arg13[%c0_33, %c0_34] : memref<1x32xf32, #tpu.memory_space<vmem>>, vector<1x32xf32>
    %64 = vector.broadcast %63 : vector<1x32xf32> to vector<8x32xf32>
    %65 = arith.addf %62, %64 : vector<8x32xf32>
    %66 = arith.truncf %65 : vector<8x32xf32> to vector<8x32xbf16>
    %c0_35 = arith.constant 0 : index
    %c0_36 = arith.constant 0 : index
    %67 = vector.load %arg14[%c0_35, %c0_36] : memref<32x64xbf16, #tpu.memory_space<vmem>>, vector<32x64xbf16>
    %cst_37 = arith.constant dense<0.000000e+00> : vector<8x64xf32>
    %68 = tpu.matmul %66, %67, %cst_37 {dimension_numbers = #tpu.dot_dimension_numbers<[1], [0], [0], [1], [0, 0, 1, 1], [], []>} : vector<8x32xbf16>, vector<32x64xbf16>, vector<8x64xf32> -> vector<8x64xf32>
    %c0_38 = arith.constant 0 : index
    %c0_39 = arith.constant 0 : index
    %69 = vector.load %arg15[%c0_38, %c0_39] : memref<1x64xf32, #tpu.memory_space<vmem>>, vector<1x64xf32>
    %70 = vector.broadcast %69 : vector<1x64xf32> to vector<8x64xf32>
    %71 = arith.addf %68, %70 : vector<8x64xf32>
    %cst_40 = arith.constant 0.000000e+00 : f32
    %72 = vector.broadcast %cst_40 : f32 to vector<8x64xf32>
    %73 = arith.maximumf %71, %72 : vector<8x64xf32>
    %74 = arith.truncf %73 : vector<8x64xf32> to vector<8x64xbf16>
    %c0_41 = arith.constant 0 : index
    %c0_42 = arith.constant 0 : index
    %75 = vector.load %arg16[%c0_41, %c0_42] : memref<64x32xbf16, #tpu.memory_space<vmem>>, vector<64x32xbf16>
    %cst_43 = arith.constant dense<0.000000e+00> : vector<8x32xf32>
    %76 = tpu.matmul %74, %75, %cst_43 {dimension_numbers = #tpu.dot_dimension_numbers<[1], [0], [0], [1], [0, 0, 1, 1], [], []>} : vector<8x64xbf16>, vector<64x32xbf16>, vector<8x32xf32> -> vector<8x32xf32>
    %c0_44 = arith.constant 0 : index
    %c0_45 = arith.constant 0 : index
    %77 = vector.load %arg17[%c0_44, %c0_45] : memref<1x32xf32, #tpu.memory_space<vmem>>, vector<1x32xf32>
    %78 = vector.broadcast %77 : vector<1x32xf32> to vector<8x32xf32>
    %79 = arith.addf %76, %78 : vector<8x32xf32>
    %80 = arith.addf %65, %79 : vector<8x32xf32>
    %cst_46 = arith.constant dense<0.000000e+00> : vector<8xf32>
    %81 = vector.multi_reduction <add>, %80, %cst_46 [1] : vector<8x32xf32> to vector<8xf32>
    %82 = vector.shape_cast %81 : vector<8xf32> to vector<8x1xf32>
    %cst_47 = arith.constant 3.200000e+01 : f32
    %83 = vector.broadcast %cst_47 : f32 to vector<8x1xf32>
    %84 = arith.divf %82, %83 : vector<8x1xf32>
    %85 = vector.broadcast %84 : vector<8x1xf32> to vector<8x32xf32>
    %86 = arith.subf %80, %85 : vector<8x32xf32>
    %87 = arith.mulf %86, %86 : vector<8x32xf32>
    %cst_48 = arith.constant dense<0.000000e+00> : vector<8xf32>
    %88 = vector.multi_reduction <add>, %87, %cst_48 [1] : vector<8x32xf32> to vector<8xf32>
    %89 = vector.shape_cast %88 : vector<8xf32> to vector<8x1xf32>
    %cst_49 = arith.constant 3.200000e+01 : f32
    %90 = vector.broadcast %cst_49 : f32 to vector<8x1xf32>
    %91 = arith.divf %89, %90 : vector<8x1xf32>
    %92 = vector.broadcast %84 : vector<8x1xf32> to vector<8x32xf32>
    %93 = arith.subf %80, %92 : vector<8x32xf32>
    %cst_50 = arith.constant 9.99999974E-6 : f32
    %94 = vector.broadcast %cst_50 : f32 to vector<8x1xf32>
    %95 = arith.addf %91, %94 : vector<8x1xf32>
    %96 = math.rsqrt %95 : vector<8x1xf32>
    %97 = vector.broadcast %96 : vector<8x1xf32> to vector<8x32xf32>
    %98 = arith.mulf %93, %97 : vector<8x32xf32>
    %c0_51 = arith.constant 0 : index
    %c0_52 = arith.constant 0 : index
    %99 = vector.load %arg18[%c0_51, %c0_52] : memref<1x32xf32, #tpu.memory_space<vmem>>, vector<1x32xf32>
    %100 = vector.broadcast %99 : vector<1x32xf32> to vector<8x32xf32>
    %101 = arith.mulf %98, %100 : vector<8x32xf32>
    %c0_53 = arith.constant 0 : index
    %c0_54 = arith.constant 0 : index
    %102 = vector.load %arg19[%c0_53, %c0_54] : memref<1x32xf32, #tpu.memory_space<vmem>>, vector<1x32xf32>
    %103 = vector.broadcast %102 : vector<1x32xf32> to vector<8x32xf32>
    %104 = arith.addf %101, %103 : vector<8x32xf32>
    %c0_55 = arith.constant 0 : index
    %c0_56 = arith.constant 0 : index
    %c0_57 = arith.constant 0 : index
    %105 = vector.load %arg20[%c0_55, %c0_56, %c0_57] : memref<1x8x32xf32, #tpu.memory_space<vmem>>, vector<1x8x32xf32>
    %106 = vector.shape_cast %105 : vector<1x8x32xf32> to vector<8x32xf32>
    %107 = vector.shape_cast %104 : vector<8x32xf32> to vector<1x8x32xf32>
    tpu.vector_store %arg20[%c0_55, %c0_56, %c0_57], %107 {strides = array<i32>} : memref<1x8x32xf32, #tpu.memory_space<vmem>>, vector<1x8x32xf32>,
    return
  }
  func.func @transform_0(%arg0: i32, %arg1: i32) -> (i32, i32, i32) {
    %c0_i32 = arith.constant 0 : i32
    %c0_i32_0 = arith.constant 0 : i32
    return %arg0, %arg1, %c0_i32 : i32, i32, i32
  }
  func.func @transform_1(%arg0: i32, %arg1: i32) -> (i32, i32, i32) {
    %c0_i32 = arith.constant 0 : i32
    %c0_i32_0 = arith.constant 0 : i32
    %c0_i32_1 = arith.constant 0 : i32
    return %arg0, %c0_i32, %c0_i32_0 : i32, i32, i32
  }
  func.func @transform_2(%arg0: i32, %arg1: i32) -> (i32, i32) {
    %c0_i32 = arith.constant 0 : i32
    %c0_i32_0 = arith.constant 0 : i32
    %c0_i32_1 = arith.constant 0 : i32
    return %c0_i32, %c0_i32_0 : i32, i32
  }
  func.func @transform_3(%arg0: i32, %arg1: i32) -> (i32, i32) {
    %c0_i32 = arith.constant 0 : i32
    %c0_i32_0 = arith.constant 0 : i32
    %c0_i32_1 = arith.constant 0 : i32
    return %c0_i32, %c0_i32_0 : i32, i32
  }
  func.func @transform_4(%arg0: i32, %arg1: i32) -> (i32, i32) {
    %c0_i32 = arith.constant 0 : i32
    %c0_i32_0 = arith.constant 0 : i32
    %c0_i32_1 = arith.constant 0 : i32
    return %c0_i32, %c0_i32_0 : i32, i32
  }
  func.func @transform_5(%arg0: i32, %arg1: i32) -> (i32, i32) {
    %c0_i32 = arith.constant 0 : i32
    %c0_i32_0 = arith.constant 0 : i32
    %c0_i32_1 = arith.constant 0 : i32
    return %c0_i32, %c0_i32_0 : i32, i32
  }
  func.func @transform_6(%arg0: i32, %arg1: i32) -> (i32, i32) {
    %c0_i32 = arith.constant 0 : i32
    %c0_i32_0 = arith.constant 0 : i32
    %c0_i32_1 = arith.constant 0 : i32
    return %c0_i32, %c0_i32_0 : i32, i32
  }
  func.func @transform_7(%arg0: i32, %arg1: i32) -> (i32, i32) {
    %c0_i32 = arith.constant 0 : i32
    %c0_i32_0 = arith.constant 0 : i32
    %c0_i32_1 = arith.constant 0 : i32
    return %c0_i32, %c0_i32_0 : i32, i32
  }
  func.func @transform_8(%arg0: i32, %arg1: i32) -> (i32, i32) {
    %c0_i32 = arith.constant 0 : i32
    %c0_i32_0 = arith.constant 0 : i32
    %c0_i32_1 = arith.constant 0 : i32
    return %c0_i32, %c0_i32_0 : i32, i32
  }
  func.func @transform_9(%arg0: i32, %arg1: i32) -> (i32, i32) {
    %c0_i32 = arith.constant 0 : i32
    %c0_i32_0 = arith.constant 0 : i32
    %c0_i32_1 = arith.constant 0 : i32
    return %c0_i32, %c0_i32_0 : i32, i32
  }
  func.func @transform_10(%arg0: i32, %arg1: i32) -> (i32, i32) {
    %c0_i32 = arith.constant 0 : i32
    %c0_i32_0 = arith.constant 0 : i32
    %c0_i32_1 = arith.constant 0 : i32
    return %c0_i32, %c0_i32_0 : i32, i32
  }
  func.func @transform_11(%arg0: i32, %arg1: i32) -> (i32, i32) {
    %c0_i32 = arith.constant 0 : i32
    %c0_i32_0 = arith.constant 0 : i32
    %c0_i32_1 = arith.constant 0 : i32
    return %c0_i32, %c0_i32_0 : i32, i32
  }
  func.func @transform_12(%arg0: i32, %arg1: i32) -> (i32, i32) {
    %c0_i32 = arith.constant 0 : i32
    %c0_i32_0 = arith.constant 0 : i32
    %c0_i32_1 = arith.constant 0 : i32
    return %c0_i32, %c0_i32_0 : i32, i32
  }
  func.func @transform_13(%arg0: i32, %arg1: i32) -> (i32, i32) {
    %c0_i32 = arith.constant 0 : i32
    %c0_i32_0 = arith.constant 0 : i32
    %c0_i32_1 = arith.constant 0 : i32
    return %c0_i32, %c0_i32_0 : i32, i32
  }
  func.func @transform_14(%arg0: i32, %arg1: i32) -> (i32, i32) {
    %c0_i32 = arith.constant 0 : i32
    %c0_i32_0 = arith.constant 0 : i32
    %c0_i32_1 = arith.constant 0 : i32
    return %c0_i32, %c0_i32_0 : i32, i32
  }
  func.func @transform_15(%arg0: i32, %arg1: i32) -> (i32, i32) {
    %c0_i32 = arith.constant 0 : i32
    %c0_i32_0 = arith.constant 0 : i32
    %c0_i32_1 = arith.constant 0 : i32
    return %c0_i32, %c0_i32_0 : i32, i32
  }
  func.func @transform_16(%arg0: i32, %arg1: i32) -> (i32, i32) {
    %c0_i32 = arith.constant 0 : i32
    %c0_i32_0 = arith.constant 0 : i32
    %c0_i32_1 = arith.constant 0 : i32
    return %c0_i32, %c0_i32_0 : i32, i32
  }
  func.func @transform_17(%arg0: i32, %arg1: i32) -> (i32, i32) {
    %c0_i32 = arith.constant 0 : i32
    %c0_i32_0 = arith.constant 0 : i32
    %c0_i32_1 = arith.constant 0 : i32
    return %c0_i32, %c0_i32_0 : i32, i32
  }
  func.func @transform_18(%arg0: i32, %arg1: i32) -> (i32, i32, i32) {
    %c0_i32 = arith.constant 0 : i32
    %c0_i32_0 = arith.constant 0 : i32
    return %arg0, %arg1, %c0_i32 : i32, i32, i32
  }
  func.func @transform_19(%arg0: i32, %arg1: i32) -> (i32, i32, i32, i32) {
    %c0_i32 = arith.constant 0 : i32
    %c0_i32_0 = arith.constant 0 : i32
    %c0_i32_1 = arith.constant 0 : i32
    return %arg0, %c0_i32, %arg1, %c0_i32_0 : i32, i32, i32, i32
  }
}

</mosaic_0001>

<bundles_post_ra>
// kernel: tpu_custom_call.1
= control target key start
LH: loop header
LB: loop body
LE: loop exit
PB: predicated region body
PF: predicated region fallthrough
CT: control target
= control target key end

     0   :  { %s3801_s0 = inlined_call_operand.vmem [shape: f32[2,8,32], index: 0, kind: input, shape index: {}]   ;;  %s3802_s1 = inlined_call_operand.hbm [shape: bf16[2,8,32], index: 1, kind: input, shape index: {}]   ;;  %s3803_s2 = inlined_call_operand.vmem [shape: bf16[32,32], index: 2, kind: input, shape index: {}]   ;;  %s3804_s3 = inlined_call_operand.vmem [shape: f32[1,32], index: 3, kind: input, shape index: {}]   ;;  %s3805_s4 = inlined_call_operand.vmem [shape: bf16[32,32], index: 4, kind: input, shape index: {}]   ;;  %s3806_s5 = inlined_call_operand.vmem [shape: f32[1,32], index: 5, kind: input, shape index: {}]   ;;  %s3807_s6 = inlined_call_operand.hbm [shape: bf16[32,32], index: 6, kind: input, shape index: {}]   ;;  %s3808_s7 = inlined_call_operand.hbm [shape: f32[1,32], index: 7, kind: input, shape index: {}]   ;;  %s3809_s8 = inlined_call_operand.hbm [shape: bf16[32,32], index: 8, kind: input, shape index: {}]   ;;  %s3810_s9 = inlined_call_operand.hbm [shape: f32[1,32], index: 9, kind: input, shape index: {}]   ;;  %s3811_s10 = inlined_call_operand.vmem [shape: f32[1,32], index: 10, kind: input, shape index: {}]   ;;  %s3812_s11 = inlined_call_operand.vmem [shape: f32[1,32], index: 11, kind: input, shape index: {}]   ;;  %s3813_s12 = inlined_call_operand.vmem [shape: bf16[32,64], index: 12, kind: input, shape index: {}]   ;;  %s3814_s13 = inlined_call_operand.vmem [shape: f32[1,64], index: 13, kind: input, shape index: {}]   ;;  %s3815_s14 = inlined_call_operand.vmem [shape: bf16[64,32], index: 14, kind: input, shape index: {}]   ;;  %s3816_s15 = inlined_call_operand.vmem [shape: f32[1,32], index: 15, kind: input, shape index: {}]   ;;  %s3817_s16 = inlined_call_operand.vmem [shape: f32[1,32], index: 16, kind: input, shape index: {}]   ;;  %s3818_s17 = inlined_call_operand.vmem [shape: f32[1,32], index: 17, kind: input, shape index: {}]   ;;  %s3819_s18 = inlined_call_operand.hbm [shape: f32[2,8,32], index: 18, kind: output, shape index: {0}]   ;;  %s3820_s19 = inlined_call_operand.hbm [shape: bf16[2,4,8,8], index: 19, kind: output, shape index: {1}]  }
   0x1   :  { %3831 = sst [smem:[#allocation21_spill]] %s3801_s0 }
   0x2   :  { %3832 = sst [smem:[#allocation22_spill]] %s3802_s1 }
   0x3   :  { %3833 = sst [smem:[#allocation23_spill]] %s3803_s2 }
   0x4   :  { %3834 = sst [smem:[#allocation24_spill]] %s3804_s3 }
   0x5   :  { %3835 = sst [smem:[#allocation25_spill]] %s3805_s4 }
   0x6   :  { %3836 = sst [smem:[#allocation26_spill]] %s3806_s5 }
   0x7   :  { %3837 = sst [smem:[#allocation27_spill]] %s3807_s6 }
   0x8   :  { %3838 = sst [smem:[#allocation28_spill]] %s3808_s7 }
   0x9   :  { %3839 = sst [smem:[#allocation29_spill]] %s3809_s8 }
   0xa   :  { %3840 = sst [smem:[#allocation30_spill]] %s3811_s10 }
   0xb   :  { %3841 = sst [smem:[#allocation31_spill]] %s3812_s11 }
   0xc   :  { %3842 = sst [smem:[#allocation32_spill]] %s3814_s13 }
   0xd   :  { %3843 = sst [smem:[#allocation33_spill]] %s3815_s14 }
   0xe   :  { %3844 = sst [smem:[#allocation34_spill]] %s3816_s15 }
   0xf   :  { %3845 = sst [smem:[#allocation35_spill]] %s3817_s16 }
  0x10   :  { %3846 = sst [smem:[#allocation36_spill]] %s3818_s17 }
  0x11   :  { %3847 = sst [smem:[#allocation37_spill]] %s3819_s18 }
  0x12   :  { %3848 = sst [smem:[#allocation38_spill]] %s3820_s19 }
  0x13   :  { %25 = vsyncpa [#allocation5], 0 }
  0x14   :  { %27 = vsyncpa [#allocation5 + $0x1], 0 }
  0x15   :  { %28 = vsyncpa [#allocation8], 0 }
  0x16   :  { %29 = vsyncpa [#allocation11], 0 }
  0x17   :  { %30 = vsyncpa [#allocation6], 0 }
  0x18   :  { %32 = vsyncpa [#allocation6 + $0x1], 0 }
  0x19   :  { %33 = vsyncpa [#allocation15], 0 }
  0x1a   :  { %35 = vsyncpa [#allocation15 + $0x1], 0  ;;  %s3211_s0 = smov 0   ;;  %s3213_s30 = smov 0  }
  0x1b   :  { %s3215_s20 = smov 0   ;;  %s3217_s21 = smov 0  }
  0x1c   :  { %s3219_s1 = smov 0   ;;  %s3221_s22 = smov 0  }
  0x1d LB: > { %s3823_s2 = sadd.s32 4294967295, %s3088_s22   ;;  %p2461_p0 = scmp.ge.s32.totalorder %s3088_s22, 1  ;;  %s3088_s22 = sphi %s3221_s22, %s41_s22   ;;  %s3084_s1 = sphi %s3219_s1, %s3887_s1   ;;  %s3080_s21 = sphi %s3217_s21, %s3886_s21   ;;  %s3076_s20 = sphi %s3215_s20, %s3885_s20   ;;  %s3072_s30 = sphi %s3213_s30, %s3884_s30   ;;  %s3068_s0 = sphi %s3211_s0, %s3883_s0  }
  0x1e   : > { %p3245_p1 = scmp.eq.s32.totalorder %s3823_s2, 0  ;;  %p504_p2 = scmp.lt.s32.totalorder %s3088_s22, 3 }
  0x1f   : > { %s3090_s25 = smov [#allocation7]   ;;  %s3091_s27 = smov [#allocation10]  }
  0x20   : > { %s3849_s23 = scalar_select %p3245_p1, 1, 0 }
  0x21   : > { %p3250_p3 = pnand %p2461_p0, %p504_p2  ;;  %s528_s3 = sshll.u32 %s3090_s25, 4  ;;  %s3254_s3 = int_to_ptr.vmem [resolvable:$true] %s528_s3 }
  0x22   : > { %s552_s28 = sshll.u32 %s3091_s27, 4  ;;  %s3092_s29 = smov [#allocation9]   ;;  %s3265_s28 = int_to_ptr.vmem [resolvable:$true] %s552_s28 }
  0x23   : > { %s3850_s24 = scalar_select %p3250_p3, 1, 0 }
  0x24   : > { %p2690_p4 = pneg %p3250_p3  ;;  %s3267_s2 = sshll.u32 %s3092_s29, 4  ;;  %s543_s2 = int_to_ptr.vmem [resolvable:$true] %s3267_s2 }
  0x25   : > { %s3852_s6 = sld [smem:[#allocation27_spill]] }
  0x26   : > { %p3261_p6 = pnand %p2690_p4, %p3245_p1 }
  0x28   : > { %p3277_p8 = pneg %p3261_p6 }
  0x2b   : > { %s2824_s17 = scalar_lea.hbm %s3852_s6, 256 }
  0x2c   : > { %p2825_p7 = scmp.ne.s32.totalorder %s3852_s6, %s2824_s17  ;;  %p2831_p11 = scmp.lt.u32.totalorder %s2824_s17, %s3852_s6 }
  0x2e   : > { %p2827_p9 = pnand %p3277_p8, %p2825_p7 }
  0x30   : > { %p2828_p10 = pneg %p2827_p9 }
  0x32   : > { %p2833_p12 = pnand %p2831_p11, %p2828_p10 }
  0x34   : > { %2836 = shalt.err (!%p2833_p12)
}
  0x35   : > { %s2837_s16 = scalar_lea.vmem %s3254_s3, 256  ;;  %p2845_p4 = scmp.lt.s32.totalorder %s3254_s3, %s3254_s3 }
  0x36   : > { %p2838_p13 = scmp.ne.s32.totalorder %s3254_s3, %s2837_s16  ;;  %p2846_p5 = scmp.lt.s32.totalorder %s2837_s16, %s2837_s16 }
  0x38   : > { %p2840_p0 = pnand %p2838_p13, %p3277_p8  ;;  %p2847_p7 = por %p2846_p5, %p2845_p4 }
  0x3a   : > { %p2841_p2 = pneg %p2840_p0 }
  0x3c   : > { %p2848_p9 = pnand %p2847_p7, %p2841_p2 }
  0x3e   : > { %2851 = shalt.err (!%p2848_p9)
}
  0x3f   : > { %s3093_s18 = smov 64   ;;  %s3094_s17 = smov 4  }
  0x40   : > { %2693 = dma.hbm_to_vmem [thread:$0]  (!%p3261_p6), %s3852_s6, 256, %s3254_s3, [#allocation8], %s3093_s18, %s3093_s18, %s3094_s17  }
  0x41   : > { %s3854_s8 = sld [smem:[#allocation29_spill]] }
  0x47   : > { %s2852_s13 = scalar_lea.hbm %s3854_s8, 256 }
  0x48   : > { %p2853_p5 = scmp.ne.s32.totalorder %s3854_s8, %s2852_s13  ;;  %p2859_p12 = scmp.lt.u32.totalorder %s2852_s13, %s3854_s8 }
  0x4a   : > { %p2855_p10 = pnand %p2853_p5, %p3277_p8 }
  0x4c   : > { %p2856_p11 = pneg %p2855_p10 }
  0x4e   : > { %p2861_p13 = pnand %p2859_p12, %p2856_p11 }
  0x50   : > { %2864 = shalt.err (!%p2861_p13)
}
  0x51   : > { %s2865_s3 = scalar_lea.vmem %s3265_s28, 256  ;;  %p2873_p7 = scmp.lt.s32.totalorder %s3265_s28, %s3265_s28 }
  0x52   : > { %p2866_p0 = scmp.ne.s32.totalorder %s3265_s28, %s2865_s3  ;;  %p2874_p9 = scmp.lt.s32.totalorder %s2865_s3, %s2865_s3 }
  0x54   : > { %p2868_p2 = pnand %p2866_p0, %p3277_p8  ;;  %p2875_p5 = por %p2874_p9, %p2873_p7 }
  0x56   : > { %p2869_p4 = pneg %p2868_p2 }
  0x58   : > { %p2876_p10 = pnand %p2875_p5, %p2869_p4 }
  0x5a   : > { %2879 = shalt.err (!%p2876_p10)
}
  0x5b   : > { %2699 = dma.hbm_to_vmem [thread:$0]  (!%p3261_p6), %s3854_s8, 256, %s3265_s28, [#allocation11], %s3093_s18, %s3093_s18, %s3094_s17  }
  0x5c   : > { %s3855_s7 = sld [smem:[#allocation28_spill]] }
  0x62   : > { %s2880_s19 = scalar_lea.hbm %s3855_s7, 16 }
  0x63   : > { %p2881_p11 = scmp.ne.s32.totalorder %s3855_s7, %s2880_s19  ;;  %p2887_p0 = scmp.lt.u32.totalorder %s2880_s19, %s3855_s7 }
  0x65   : > { %p2883_p12 = pnand %p2881_p11, %p3277_p8 }
  0x67   : > { %p2884_p13 = pneg %p2883_p12 }
  0x69   : > { %p2889_p2 = pnand %p2887_p0, %p2884_p13 }
  0x6b   : > { %2892 = shalt.err (!%p2889_p2)
}
  0x6c   : > { %s2893_s3 = scalar_lea.vmem %s543_s2, 16  ;;  %s2900_s28 = scalar_lea.vmem %s543_s2, 32 }
  0x6d   : > { %p2894_p4 = scmp.ne.s32.totalorder %s543_s2, %s2893_s3  ;;  %p2901_p5 = scmp.lt.s32.totalorder %s543_s2, %s543_s2 }
  0x6e   : > { %p2902_p10 = scmp.lt.s32.totalorder %s2900_s28, %s2893_s3 }
  0x6f   : > { %p2896_p7 = pnand %p2894_p4, %p3277_p8 }
  0x70   : > { %p2903_p3 = por %p2902_p10, %p2901_p5 }
  0x71   : > { %p2897_p9 = pneg %p2896_p7 }
  0x73   : > { %p2904_p1 = pnand %p2903_p3, %p2897_p9 }
  0x75   : > { %2907 = shalt.err (!%p2904_p1)
}
  0x76   : > { %2696 = dma.hbm_to_vmem [thread:$0]  (!%p3261_p6), %s3855_s7, 16, %s543_s2, [#allocation8]  }
  0x77   : > { %s3095_s10 = smov [#allocation12]   ;;  %s2908_s19 = scalar_lea.hbm %s3810_s9, 16 }
  0x78   : > { %s566_s11 = sshll.u32 %s3095_s10, 4  ;;  %p2909_p11 = scmp.ne.s32.totalorder %s3810_s9, %s2908_s19  ;;  %s567_s11 = int_to_ptr.vmem [resolvable:$true] %s566_s11 }
  0x79   : > { %p2915_p12 = scmp.lt.u32.totalorder %s2908_s19, %s3810_s9 }
  0x7a   : > { %p2911_p1 = pnand %p2909_p11, %p3277_p8 }
  0x7c   : > { %p2912_p3 = pneg %p2911_p1 }
  0x7e   : > { %p2917_p13 = pnand %p2915_p12, %p2912_p3 }
  0x80   : > { %2920 = shalt.err (!%p2917_p13)
}
  0x81   : > { %s2921_s2 = scalar_lea.vmem %s567_s11, 16  ;;  %s2928_s3 = scalar_lea.vmem %s567_s11, 32 }
  0x82   : > { %p2922_p0 = scmp.ne.s32.totalorder %s567_s11, %s2921_s2  ;;  %p2929_p7 = scmp.lt.s32.totalorder %s567_s11, %s567_s11 }
  0x83   : > { %p2930_p9 = scmp.lt.s32.totalorder %s2928_s3, %s2921_s2 }
  0x84   : > { %p2924_p2 = pnand %p2922_p0, %p3277_p8 }
  0x85   : > { %p2931_p5 = por %p2930_p9, %p2929_p7 }
  0x86   : > { %p2925_p4 = pneg %p2924_p2 }
  0x88   : > { %p2932_p10 = pnand %p2931_p5, %p2925_p4 }
  0x8a   : > { %2935 = shalt.err (!%p2932_p10)
}
  0x8b   : > { %2702 = dma.hbm_to_vmem [thread:$0]  (!%p3261_p6), %s3810_s9, 16, %s567_s11, [#allocation11]  }
  0x8c   : > { %s2460_s15 = sadd.s32 4294967294, %s3088_s22   ;;  %s53_s17 = sadd.s32 1, %s3084_s1 }
  0x8d   : > { %p55_p8 = scmp.ge.s32.totalorder %s53_s17, 2  ;;  %s88_s26 = sadd.s32 1, %s3076_s20 }
  0x8e   : > { %p95_p11 = scmp.ne.s32.totalorder %s3076_s20, %s3072_s30  ;;  %p96_p1 = scmp.eq.s32.totalorder %s3088_s22, 0 }
  0x8f   : > { %s3889_s17 = smov (%p55_p8, %s53_s17), 0  ;;  %p101_p12 = scmp.ne.s32.totalorder %s3072_s30, %s3068_s0 }
  0x90   : > { %p3366_p3 = por %p96_p1, %p95_p11  ;;  %s85_s11 = ssub.s32 %s3084_s1, %s3889_s17 }
  0x91   : > { %s3857_s13 = sadd.s32 4294967295, %s3088_s22   ;;  %p86_p13 = scmp.eq.s32.totalorder %s85_s11, 0 }
  0x92   : > { %p463_p6 = scmp.eq.s32.totalorder %s3857_s13, 1  ;;  %p3858_p0 = scmp.ne.s32.totalorder %s3849_s23, 0 }
  0x93   : > { %p469_p7 = scmp.eq.s32.totalorder %s2460_s15, 1  ;;  %p2718_p5 = scmp.lt.s32.totalorder %s3088_s22, 2 }
  0x94   : > { %p3378_p2 = por %p3858_p0, %p101_p12  ;;  %p3382_p4 = por %p463_p6, %p95_p11 }
  0x95   : > { %s3387_s25 = scalar_select %p86_p13, %s3076_s20, %s88_s26  }
  0x96   : > { %s3860_s19 = scalar_select %p3382_p4, 1, 0 }
  0x97   : > { %p3389_p9 = por %p469_p7, %p101_p12  ;;  %s611_s29 = sand.u32 1, %s3076_s20  }
  0x98   : > { %s2468_s16 = sshll.u32 %s3084_s1, 6  ;;  %s2467_s2 = sshll.u32 %s611_s29, 2 }
  0x99   : > { %s3861_s27 = scalar_select %p3389_p9, 1, 0 }
  0x9a   : > { %s3862_s18 = sld [smem:[#allocation22_spill]]  ;;  %s615_s15 = scalar_lea.vmem [#allocation4], %s2467_s2 }
  0x9b   : > { %s622_s26 = sshll.u32 %s615_s15, 4  ;;  %p3403_p10 = pnand %p2718_p5, %p3366_p3  ;;  %s3407_s26 = int_to_ptr.vmem [resolvable:$true] %s622_s26 }
  0x9c   : > { %s612_s6 = scalar_lea.sflag [#allocation5], %s611_s29 }
  0x9d   : > { %p2938_p11 = pneg %p3403_p10 }
  0xa0   : > { %s3399_s11 = scalar_lea.hbm %s3862_s18, %s2468_s16  ;;  %s2941_s10 = scalar_lea.hbm %s3862_s18, 128 }
  0xa1   : > { %s2936_s7 = scalar_lea.hbm %s3399_s11, 64  ;;  %p2942_p3 = scmp.lt.u32.totalorder %s3399_s11, %s3862_s18 }
  0xa2   : > { %p2937_p8 = scmp.ne.s32.totalorder %s3399_s11, %s2936_s7  ;;  %p2943_p6 = scmp.lt.u32.totalorder %s2941_s10, %s2936_s7 }
  0xa3   : > { %p2945_p0 = scmp.lt.u32.totalorder %s2936_s7, %s3399_s11 }
  0xa4   : > { %p2939_p1 = pnand %p2938_p11, %p2937_p8  ;;  %p2944_p13 = por %p2943_p6, %p2942_p3 }
  0xa6   : > { %p2940_p12 = pneg %p2939_p1  ;;  %p2946_p7 = por %p2945_p0, %p2944_p13 }
  0xa8   : > { %p2947_p5 = pnand %p2946_p7, %p2940_p12 }
  0xaa   : > { %2950 = shalt.err (!%p2947_p5)
}
  0xab   : > { %s2951_s29 = scalar_lea.vmem %s3407_s26, 64  ;;  %s3096_s15 = smov [#allocation4]  }
  0xac   : > { %p2952_p8 = scmp.ne.s32.totalorder %s3407_s26, %s2951_s29  ;;  %s2956_s16 = sshll.u32 %s3096_s15, 4  ;;  %s2957_s16 = int_to_ptr.vmem [resolvable:$false] %s2956_s16 }
  0xad   : > { %s2958_s2 = scalar_lea.vmem %s2957_s16, 128  ;;  %p2959_p4 = scmp.lt.s32.totalorder %s3407_s26, %s2957_s16 }
  0xae   : > { %p2954_p1 = pnand %p2952_p8, %p2938_p11  ;;  %p2960_p3 = scmp.lt.s32.totalorder %s2958_s2, %s2951_s29 }
  0xb0   : > { %p2955_p9 = pneg %p2954_p1  ;;  %p2961_p6 = por %p2960_p3, %p2959_p4 }
  0xb2   : > { %p2962_p13 = pnand %p2961_p6, %p2955_p9 }
  0xb4   : > { %2965 = shalt.err (!%p2962_p13)
}
  0xb5   : > { %2706 = dma.hbm_to_vmem [thread:$0]  (!%p3403_p10), %s3399_s11, 64, %s3407_s26, %s612_s6  }
  0xb6   : > { %p3864_p12 = scmp.ne.s32.totalorder %s3850_s24, 0 }
  0xb7   : > { %s3437_s7 = sand.u32 (!%p3864_p12), 1, %s3072_s30  }
  0xb8   : > { %631 = sbr.rel (%p3864_p12) target bundleno = 2764 (0xacc), region = 92  ;;  %s2470_s10 = sshll.u32 (!%p3864_p12), %s3437_s7, 2 }
  0xb9   : > { %s634_s3 = scalar_lea.sflag (!%p3864_p12), [#allocation5], %s3437_s7  ;;  %s637_s28 = scalar_lea.vmem (!%p3864_p12), [#allocation4], %s2470_s10 }
  0xbf   : > { %3047 = dma.done.wait (%p3378_p2), %s634_s3, 64  }
  0xc0   : > { %3049 = vsyncadd (%p3378_p2), %s634_s3, 4294967232  ;;  %p3865_p4 = scmp.ne.s32.totalorder %s3849_s23, 0 }
  0xc2   : > { %3051 = dma.done.wait (%p3865_p4), [#allocation8], 272  }
  0xc3   : > { %3053 = vsyncadd (%p3865_p4), [#allocation8], 4294967024 }
  0xc4   : > { %3055 = dma.done.wait (%p3865_p4), [#allocation11], 272  }
  0xc5   : > { %3057 = vsyncadd (%p3865_p4), [#allocation11], 4294967024  ;;  %v3097_v0 = vmov 0.0   ;;  %vm3098_vm0 = vmmov 0   ;;  %p720_p2 = scmp.lt.s32.totalorder %s3080_s21, 1  ;;  %s3866_s4 = sld [smem:[#allocation25_spill]]  ;;  %v878_v24 = vlaneseq }
  0xc6   : > { %2568 = vmatprep.subr.bf16.mxu0 %v3097_v0  ;;  %2572 = vmatprep.mubr.msk.bf16.mxu0 %vm3098_vm0, %v3097_v0  ;;  %v732_v3 = vld [vmem:[%s637_s28] sm:$0xf]  ;;  %vm756_vm1 = vcmask 261120   ;;  %s3867_s15 = sld [smem:[#allocation23_spill]]  ;;  %s3868_s10 = sld [smem:[#allocation21_spill]]  ;;  %v2794_v18 = vld [vmem:[#allocation7] sm:$0xff]  }
  0xc7   : > { %2576 = vmatprep.subr.bf16.mxu1 %v3097_v0  ;;  %2580 = vmatprep.mubr.msk.bf16.mxu1 %vm3098_vm0, %v3097_v0  ;;  %s721_s6 = scalar_select %p720_p2, %s3080_s21, 1  ;;  %v2795_v21 = vld [vmem:[#allocation7 + $0x8] sm:$0xff]   ;;  %v3102_v22 = vmov 1983009808   ;;  %v3103_v25 = vmov 1934713408  }
  0xc8   : > { %s3869_s5 = sld [smem:[#allocation26_spill]]  ;;  %s3099_s23 = smov 104   ;;  %2577 = vmatpush3.bf16.msra.mxu1 %v2794_v18  ;;  %v876_v23 = vunpack.c.l.s4 %v3102_v22  ;;  %v908_v26 = vunpack.c.l.s4 %v3103_v25  ;;  %v879_v28 = vshrl.u32 %v878_v24, 7  ;;  %vm1013_vm2 = vcmask 60416  }
  0xc9   : > { %s2477_s26 = sshll.u32 %s721_s6, 3  ;;  %s3100_s11 = smov 120   ;;  %2578 = vmatprep.subr.bf16.mxu1 %v3097_v0  ;;  %vm1395_vm3 = vcmask 64512   ;;  %vm1640_vm4 = vcmask 1043456   ;;  %vm1971_vm5 = vcmask 130048   ;;  %vm1973_vm6 = vcmask 195584  }
  0xca   : > { %s3870_s29 = sld [smem:[#allocation24_spill]]  ;;  %s3101_s16 = smov 112   ;;  %v877_v27 = vunpack.c.0.s8 %v876_v23  ;;  %v909_v31 = vunpack.c.0.s8 %v908_v26  ;;  %vm2181_vm7 = vcmask 523264  }
  0xcb   : > { %v2790_v1 = vld [vmem:[%s3866_s4] sm:$0xff]   ;;  %v2791_v2 = vld [vmem:[%s3866_s4 + $0x8] sm:$0xff]   ;;  %s2476_s2 = sshll.u32 %s3437_s7, 4  ;;  %s3105_s24 = smov 8  }
  0xcc   : > { %2569 = vmatpush3.bf16.msra.mxu0 %v2790_v1  ;;  %v2792_v4 = vld [vmem:[%s3867_s15] sm:$0xff]   ;;  %s726_s3 = scalar_lea.vmem %s3868_s10, %s2477_s26  ;;  %v2793_v5 = vld [vmem:[%s3867_s15 + $0x8] sm:$0xff]   ;;  %2579 = vmatpush3.bf16.msra.mxu1 %v2795_v21  ;;  %v3507_v32 = vsub.s32 %v877_v27, %v879_v28  ;;  %v3509_v38 = vsub.s32 %v909_v31, %v879_v28  ;;  %s3617_s10 = scalar_lea.vmem [#allocation14], %s2476_s2 }
  0xcd   : > { %2570 = vmatprep.subr.bf16.mxu0 %v3097_v0  ;;  %v3478_v6 = vld [vmem:[%s726_s3] sm:$0xff]  ;;  %2592 = vmatprep.subr.bf16.mxu1 %v3097_v0  ;;  %s3104_s3 = smov 16   ;;  %s3106_s14 = smov 24  }
  0xce   : > { %v1173_v7 = vpack.c.bf16 %v3478_v6, %v3478_v6  ;;  %v2478_v8 = vld [vmem:[%s3869_s5] ss:$0 sm:$0xff]  ;;  %s3875_s6 = sld [smem:[#allocation34_spill]]  ;;  %p3877_p10 = scmp.ne.s32.totalorder %s3860_s19, 0 }
  0xcf   : > { %2581 = vmatmul.mubr.msk.bf16.vlgmr.msra.gmra.mrb[0].mxu1 %vm756_vm1, %v732_v3 }
  0xd0   : > { %2571 = vmatpush3.bf16.msra.mxu0 %v2791_v2  ;;  %v2490_v14 = vld [vmem:[%s3870_s29] ss:$0 sm:$0xff]  ;;  %2594 = vmatprep.mubr.msk.bf16.mxu1 %vm3098_vm0, %v3097_v0  ;;  %s3871_s29 = sld [smem:[#allocation33_spill]] }
  0xd1   : > { %2584 = vmatprep.subr.bf16.mxu0 %v3097_v0 }
  0xd3   : > { %2573 = vmatmul.mubr.msk.bf16.vlgmr.msra.gmra.mrb[0].mxu0 %vm756_vm1, %v732_v3 }
  0xd4   : > { %2585 = vmatpush3.bf16.msra.mxu0 %v2792_v4  ;;  %2588 = vmatprep.mubr.msk.bf16.mxu0 %vm3098_vm0, %v3097_v0 }
  0xd5   : > { %2586 = vmatprep.subr.bf16.mxu0 %v3097_v0 }
  0xd8   : > { %2587 = vmatpush3.bf16.msra.mxu0 %v2793_v5 }
  0xd9   : > { %2598 = vmatprep.subr.bf16.mxu0 %v3097_v0 }
  0xdb   : > { %2589 = vmatmul.mubr.msk.bf16.vlgmr.msra.gmra.mrb[4].mxu0 %vm756_vm1, %v1173_v7 }
  0xdc   : > { %2600 = vmatprep.mubr.msk.bf16.mxu0 %vm3098_vm0, %v3097_v0 }
 0x1a6   : > { %v794_v9 = vpop.f32.mrb[0].mxu0 }
 0x1a7   : > { %v795_v10 = vadd.f32 %v2478_v8, %v794_v9  ;;  %v2574_v11 = vpop.f32.mrb[1].mxu0 }
 0x1a8   : > { %v797_v12 = vpop.f32.mrb[2].mxu0 }
 0x1a9   : > { %870 = vrot.lane.b32.xlu1 %v795_v10, %s3099_s23  ;;  %864 = vrot.lane.b32.xlu0 %v795_v10, %s3100_s11  ;;  %v2575_v13 = vpop.f32.mrb[3].mxu0 }
 0x1ad   : > { %867 = vrot.lane.b32.xlu0 %v795_v10, %s3101_s16 }
 0x1ae   : > { %v1235_v15 = vpop.f32.mrb[4].mxu0 }
 0x1af   : > { %v1236_v16 = vadd.f32 %v2490_v14, %v1235_v15  ;;  %v2590_v17 = vpop.f32.mrb[5].mxu0 }
 0x1b0   : > { %v1238_v19 = vpop.f32.mrb[6].mxu0 }
 0x1b1   : > { %1245 = vrot.lane.b32.xlu0 %v1236_v16, %s3101_s16  ;;  %1242 = vrot.lane.b32.xlu1 %v1236_v16, %s3100_s11  ;;  %v2591_v20 = vpop.f32.mrb[7].mxu0 }
 0x1b5   : > { %1248 = vrot.lane.b32.xlu1 %v1236_v16, %s3099_s23 }
 0x21b   : > { %v871_v29 = vpop.permute.xlu1 %870  ;;  %v865_v30 = vpop.permute.xlu0 %864 }
 0x21c   : > { %v889_v33 = vcombine.low %v865_v30, %v871_v29  ;;  %v890_v34 = vcombine.high %v865_v30, %v871_v29 }
 0x21e   : > { %v897_v39 = vrot.slane %v889_v33, %v3507_v32  ;;  %v904_v40 = vrot.slane %v890_v34, %v3507_v32 }
 0x21f   : > { %v868_v35 = vpop.permute.xlu0 %867 }
 0x220   : > { %v873_v36 = vcombine.low %v795_v10, %v868_v35  ;;  %v874_v37 = vcombine.high %v795_v10, %v868_v35 }
 0x222   : > { %v881_v41 = vrot.slane %v873_v36, %v3507_v32  ;;  %v888_v42 = vrot.slane %v874_v37, %v3507_v32 }
 0x223   : > { %v1243_v43 = vpop.permute.xlu1 %1242  ;;  %v1246_v48 = vpop.permute.xlu0 %1245 }
 0x224   : > { %v905_v44 = vcombine.low %v881_v41, %v897_v39  ;;  %v906_v45 = vcombine.high %v881_v41, %v897_v39  ;;  %v921_v46 = vcombine.low %v888_v42, %v904_v40  ;;  %v922_v47 = vcombine.high %v888_v42, %v904_v40 }
 0x225   : > { %v1251_v53 = vcombine.low %v1236_v16, %v1246_v48  ;;  %v1252_v54 = vcombine.high %v1236_v16, %v1246_v48 }
 0x226   : > { %v913_v49 = vrot.slane %v905_v44, %v3509_v38  ;;  %v920_v50 = vrot.slane %v906_v45, %v3509_v38  ;;  %v929_v51 = vrot.slane %v921_v46, %v3509_v38  ;;  %v936_v52 = vrot.slane %v922_v47, %v3509_v38 }
 0x227   : > { %v1249_v55 = vpop.permute.xlu1 %1248  ;;  %v1259_v3 = vrot.slane %v1251_v53, %v3507_v32  ;;  %v1266_v4 = vrot.slane %v1252_v54, %v3507_v32 }
 0x228   : > { %v941_v56 = vcombine.low %v913_v49, %v920_v50  ;;  %v2486_v57 = vcombine.high %v913_v49, %v920_v50  ;;  %v957_v58 = vcombine.low %v929_v51, %v936_v52  ;;  %v2487_v59 = vcombine.high %v929_v51, %v936_v52 }
 0x229   : > { %v1267_v60 = vcombine.low %v1243_v43, %v1249_v55  ;;  %v1268_v61 = vcombine.high %v1243_v43, %v1249_v55 }
 0x22a   : > { %v948_v62 = vrot.slane %v941_v56, %v3507_v32  ;;  %v956_v63 = vrot.slane %v2486_v57, %v3507_v32  ;;  %v964_v1 = vrot.slane %v957_v58, %v3507_v32  ;;  %v972_v2 = vrot.slane %v2487_v59, %v3507_v32 }
 0x22b   : > { %v1275_v5 = vrot.slane %v1267_v60, %v3507_v32  ;;  %v1282_v7 = vrot.slane %v1268_v61, %v3507_v32 }
 0x22c   : > { %v973_v8 = vcombine.low %v948_v62, %v956_v63  ;;  %v974_v9 = vcombine.high %v948_v62, %v956_v63  ;;  %v989_v10 = vcombine.low %v964_v1, %v972_v2  ;;  %v990_v11 = vcombine.high %v964_v1, %v972_v2 }
 0x22d   : > { %v1283_v12 = vcombine.low %v1259_v3, %v1275_v5  ;;  %v1284_v13 = vcombine.high %v1259_v3, %v1275_v5  ;;  %v1299_v14 = vcombine.low %v1266_v4, %v1282_v7  ;;  %v1300_v15 = vcombine.high %v1266_v4, %v1282_v7  ;;  %v857_v3 = vpop.f32.mrb[0].mxu1 }
 0x22e   : > { %v981_v16 = vrot.slane %v973_v8, %v3509_v38  ;;  %v988_v17 = vrot.slane %v974_v9, %v3509_v38  ;;  %v997_v18 = vrot.slane %v989_v10, %v3509_v38  ;;  %v1004_v19 = vrot.slane %v990_v11, %v3509_v38  ;;  %v2582_v4 = vpop.f32.mrb[1].mxu1 }
 0x22f   : > { %v1291_v20 = vrot.slane %v1283_v12, %v3509_v38  ;;  %v1298_v21 = vrot.slane %v1284_v13, %v3509_v38  ;;  %v1307_v22 = vrot.slane %v1299_v14, %v3509_v38  ;;  %v1314_v23 = vrot.slane %v1300_v15, %v3509_v38  ;;  %v860_v5 = vpop.f32.mrb[2].mxu1 }
 0x230   : > { %v1005_v24 = vcombine.low %v981_v16, %v997_v18  ;;  %v1006_v25 = vcombine.high %v981_v16, %v997_v18  ;;  %v1007_v26 = vcombine.low %v988_v17, %v1004_v19  ;;  %v1008_v27 = vcombine.high %v988_v17, %v1004_v19  ;;  %v2583_v7 = vpop.f32.mrb[3].mxu1 }
 0x231   : > { %v1319_v28 = vcombine.low %v1291_v20, %v1298_v21  ;;  %v2494_v29 = vcombine.high %v1291_v20, %v1298_v21  ;;  %v1335_v30 = vcombine.low %v1307_v22, %v1314_v23  ;;  %v2495_v31 = vcombine.high %v1307_v22, %v1314_v23 }
 0x232   : > { %v1009_v33 = vpack.c.bf16 %v1005_v24, %v1005_v24  ;;  %v1010_v34 = vpack.c.bf16 %v1006_v25, %v1006_v25  ;;  %v1011_v35 = vpack.c.bf16 %v1007_v26, %v1007_v26  ;;  %v1012_v36 = vpack.c.bf16 %v1008_v27, %v1008_v27 }
 0x233   : > { %v1326_v37 = vrot.slane %v1319_v28, %v3507_v32  ;;  %v1334_v39 = vrot.slane %v2494_v29, %v3507_v32  ;;  %v1342_v40 = vrot.slane %v1335_v30, %v3507_v32  ;;  %v1350_v41 = vrot.slane %v2495_v31, %v3507_v32  ;;  %v2482_v28 = vld [vmem:[#allocation9] ss:$0 sm:$0xff] }
 0x234   : > { %1014 = vst.msk [vmem:[#allocation2] sm:$0xf] %vm1013_vm2, %v1009_v33  ;;  %1015 = vst.msk [vmem:[#allocation2 + $0x4] sm:$0xf] %vm1013_vm2, %v1010_v34  ;;  %v858_v29 = vadd.f32 %v2482_v28, %v857_v3 }
 0x235   : > { %1016 = vst.msk [vmem:[#allocation2 + $0x8] sm:$0xf] %vm1013_vm2, %v1011_v35  ;;  %1017 = vst.msk [vmem:[#allocation2 + $0xc] sm:$0xf] %vm1013_vm2, %v1012_v36  ;;  %v1351_v42 = vcombine.low %v1326_v37, %v1334_v39  ;;  %v1367_v43 = vcombine.low %v1342_v40, %v1350_v41  ;;  %v1352_v50 = vcombine.high %v1326_v37, %v1334_v39 }
 0x236   : > { %v1368_v51 = vcombine.high %v1342_v40, %v1350_v41 }
 0x237   : > { %v1359_v44 = vrot.slane %v1351_v42, %v3509_v38  ;;  %v1375_v45 = vrot.slane %v1367_v43, %v3509_v38  ;;  %v1366_v58 = vrot.slane %v1352_v50, %v3509_v38 }
 0x238   : > { %v1382_v59 = vrot.slane %v1368_v51, %v3509_v38 }
 0x239   : > { %v1383_v52 = vcombine.low %v1359_v44, %v1375_v45  ;;  %v1384_v53 = vcombine.high %v1359_v44, %v1375_v45 }
 0x23a   : > { %v1385_v62 = vcombine.low %v1366_v58, %v1382_v59  ;;  %v1386_v63 = vcombine.high %v1366_v58, %v1382_v59 }
 0x23b   : > { %v1391_v46 = vld [vmem:[#allocation2] sm:$0xf]  ;;  %v1392_v47 = vld [vmem:[#allocation2 + $0x4] sm:$0xf]  ;;  %v1387_v56 = vpack.c.bf16 %v1383_v52, %v1383_v52  ;;  %v1388_v57 = vpack.c.bf16 %v1384_v53, %v1384_v53 }
 0x23c   : > { %v1400_v48 = vsel %vm1395_vm3, %v1391_v46, 0  ;;  %v1446_v49 = vsel %vm1395_vm3, %v1392_v47, 0  ;;  %v1393_v54 = vld [vmem:[#allocation2 + $0x8] sm:$0xf]  ;;  %v1394_v55 = vld [vmem:[#allocation2 + $0xc] sm:$0xf]  ;;  %v1389_v1 = vpack.c.bf16 %v1385_v62, %v1385_v62  ;;  %v1390_v2 = vpack.c.bf16 %v1386_v63, %v1386_v63 }
 0x23d   : > { %2593 = vmatpush3.bf16.xpose.msra.mxu1 %v1400_v48  ;;  %2599 = vmatpush3.bf16.xpose.msra.mxu0 %v1446_v49  ;;  %v1492_v60 = vsel %vm1395_vm3, %v1393_v54, 0  ;;  %v1538_v61 = vsel %vm1395_vm3, %v1394_v55, 0 }
 0x23e   : > { %2604 = vmatprep.subr.bf16.mxu1 %v3097_v0  ;;  %2610 = vmatprep.subr.bf16.mxu0 %v3097_v0 }
 0x244   : > { %2595 = vmatmul.mubr.msk.bf16.vlgmr.msra.gmra.mrb[4].mxu1 %vm1395_vm3, %v1387_v56  ;;  %2601 = vmatmul.mubr.msk.bf16.vlgmr.msra.gmra.mrb[8].mxu0 %vm1395_vm3, %v1388_v57 }
 0x245   : > { %2605 = vmatpush3.bf16.xpose.msra.mxu1 %v1492_v60  ;;  %2611 = vmatpush3.bf16.xpose.msra.mxu0 %v1538_v61 }
 0x246   : > { %2606 = vmatprep.mubr.msk.bf16.mxu1 %vm3098_vm0, %v3097_v0  ;;  %2612 = vmatprep.mubr.msk.bf16.mxu0 %vm3098_vm0, %v3097_v0 }
 0x247   : > { %2616 = vmatprep.subr.bf16.mxu1 %v3097_v0  ;;  %2622 = vmatprep.subr.bf16.mxu0 %v3097_v0 }
 0x24c   : > { %2607 = vmatmul.mubr.msk.bf16.vlgmr.msra.gmra.mrb[8].mxu1 %vm1395_vm3, %v1389_v1  ;;  %2613 = vmatmul.mubr.msk.bf16.vlgmr.msra.gmra.mrb[12].mxu0 %vm1395_vm3, %v1390_v2 }
 0x24d   : > { %2618 = vmatprep.mubr.msk.bf16.mxu1 %vm3098_vm0, %v3097_v0  ;;  %2624 = vmatprep.mubr.msk.bf16.mxu0 %vm3098_vm0, %v3097_v0 }
 0x317   : > { %v1436_v8 = vpop.f32.mrb[4].mxu1  ;;  %v1482_v9 = vpop.f32.mrb[8].mxu0 }
 0x318   : > { %v2596_v10 = vpop.f32.mrb[5].mxu1  ;;  %v2602_v11 = vpop.f32.mrb[9].mxu0  ;;  %v1580_v12 = vsel %vm1395_vm3, %v1436_v8, -inf  ;;  %v1583_v13 = vsel %vm1395_vm3, %v1482_v9, -inf }
 0x319   : > { %1581 = vmax.xlane.f32.xlu0 %v1580_v12  ;;  %v1439_v14 = vpop.f32.mrb[6].mxu1  ;;  %1584 = vmax.xlane.f32.xlu1 %v1583_v13  ;;  %v1485_v15 = vpop.f32.mrb[10].mxu0 }
 0x31a   : > { %v2597_v16 = vpop.f32.mrb[7].mxu1  ;;  %v2603_v17 = vpop.f32.mrb[11].mxu0 }
 0x31f   : > { %v1528_v18 = vpop.f32.mrb[8].mxu1  ;;  %v1574_v19 = vpop.f32.mrb[12].mxu0 }
 0x320   : > { %v2608_v20 = vpop.f32.mrb[9].mxu1  ;;  %v2614_v21 = vpop.f32.mrb[13].mxu0  ;;  %v1586_v22 = vsel %vm1395_vm3, %v1528_v18, -inf  ;;  %v1589_v27 = vsel %vm1395_vm3, %v1574_v19, -inf }
 0x321   : > { %1587 = vmax.xlane.f32.xlu0 %v1586_v22  ;;  %v1531_v23 = vpop.f32.mrb[10].mxu1  ;;  %v1577_v24 = vpop.f32.mrb[14].mxu0 }
 0x322   : > { %v2609_v25 = vpop.f32.mrb[11].mxu1  ;;  %v2615_v26 = vpop.f32.mrb[15].mxu0 }
 0x325   : > { %1590 = vmax.xlane.f32.xlu0 %v1589_v27 }
 0x32a   : > { %1019 = vrot.lane.b32.xlu1 %v858_v29, %s3100_s11  ;;  %s2290_s11 = sshll.u32 %s3617_s10, 4  ;;  %s3714_s11 = int_to_ptr.vmem [resolvable:$true] %s2290_s11 }
 0x32e   : > { %1025 = vrot.lane.b32.xlu1 %v858_v29, %s3099_s23  ;;  %s3873_s23 = sld [smem:[#allocation31_spill]] }
 0x33b   : > { %1022 = vrot.lane.b32.xlu0 %v858_v29, %s3101_s16  ;;  %s3876_s16 = sld [smem:[#allocation38_spill]] }
 0x3a6   : > { %v1582_v30 = vpop.xlane.xlu0 %1581  ;;  %v1585_v31 = vpop.xlane.xlu1 %1584 }
 0x3a7   : > { %v1592_v33 = vsub.f32 %v1436_v8, %v1582_v30  ;;  %v1593_v34 = vsub.f32 %v1482_v9, %v1585_v31 }
 0x3a9   : > { %v1596_v35 = vmul.f32 1.442695, %v1592_v33  ;;  %v1598_v36 = vmul.f32 1.442695, %v1593_v34 }
 0x3aa   : > { %v1020_v37 = vpop.permute.xlu1 %1019 }
 0x3ab   : > { %2804 = vpow2.f32 %v1596_v35 }
 0x3ac   : > { %2806 = vpow2.f32 %v1598_v36 }
 0x3ae   : > { %v1588_v39 = vpop.xlane.xlu0 %1587  ;;  %v1026_v42 = vpop.permute.xlu1 %1025 }
 0x3af   : > { %v1594_v40 = vsub.f32 %v1528_v18, %v1588_v39  ;;  %v1044_v46 = vcombine.low %v1020_v37, %v1026_v42  ;;  %v1045_v47 = vcombine.high %v1020_v37, %v1026_v42 }
 0x3b1   : > { %v1600_v41 = vmul.f32 1.442695, %v1594_v40  ;;  %v1052_v55 = vrot.slane %v1044_v46, %v3507_v32  ;;  %v1059_v56 = vrot.slane %v1045_v47, %v3507_v32 }
 0x3b2   : > { %v1591_v43 = vpop.xlane.xlu0 %1590 }
 0x3b3   : > { %2808 = vpow2.f32 %v1600_v41  ;;  %v1595_v44 = vsub.f32 %v1574_v19, %v1591_v43 }
 0x3b5   : > { %v3574_v45 = vpop.eup %2804  ;;  %v1602_v48 = vmul.f32 1.442695, %v1595_v44 }
 0x3b6   : > { %v3576_v49 = vpop.eup %2806  ;;  %v1023_v50 = vpop.permute.xlu0 %1022  ;;  %v1604_v51 = vsel %vm1395_vm3, %v3574_v45, 0.0 }
 0x3b7   : > { %2810 = vpow2.f32 %v1602_v48  ;;  %v1028_v52 = vcombine.low %v858_v29, %v1023_v50  ;;  %v1029_v53 = vcombine.high %v858_v29, %v1023_v50  ;;  %1605 = vadd.xlane.f32.xlu1 %v1604_v51  ;;  %v1607_v54 = vsel %vm1395_vm3, %v3576_v49, 0.0 }
 0x3b8   : > { %1608 = vadd.xlane.f32.xlu0 %v1607_v54 }
 0x3b9   : > { %v1036_v57 = vrot.slane %v1028_v52, %v3507_v32  ;;  %v1043_v58 = vrot.slane %v1029_v53, %v3507_v32 }
 0x3bb   : > { %v1060_v59 = vcombine.low %v1036_v57, %v1052_v55  ;;  %v1061_v60 = vcombine.high %v1036_v57, %v1052_v55  ;;  %v1076_v61 = vcombine.low %v1043_v58, %v1059_v56  ;;  %v1077_v62 = vcombine.high %v1043_v58, %v1059_v56 }
 0x3bd   : > { %v3586_v63 = vpop.eup %2808  ;;  %v1068_v1 = vrot.slane %v1060_v59, %v3509_v38  ;;  %v1075_v2 = vrot.slane %v1061_v60, %v3509_v38  ;;  %v1084_v3 = vrot.slane %v1076_v61, %v3509_v38  ;;  %v1091_v4 = vrot.slane %v1077_v62, %v3509_v38 }
 0x3be   : > { %v1610_v5 = vsel %vm1395_vm3, %v3586_v63, 0.0 }
 0x3bf   : > { %v1096_v7 = vcombine.low %v1068_v1, %v1075_v2  ;;  %v2488_v8 = vcombine.high %v1068_v1, %v1075_v2  ;;  %v1112_v9 = vcombine.low %v1084_v3, %v1091_v4  ;;  %v2489_v10 = vcombine.high %v1084_v3, %v1091_v4  ;;  %1611 = vadd.xlane.f32.xlu0 %v1610_v5 }
 0x3c1   : > { %v3594_v11 = vpop.eup %2810  ;;  %v1103_v12 = vrot.slane %v1096_v7, %v3507_v32  ;;  %v1111_v13 = vrot.slane %v2488_v8, %v3507_v32  ;;  %v1119_v14 = vrot.slane %v1112_v9, %v3507_v32  ;;  %v1127_v15 = vrot.slane %v2489_v10, %v3507_v32 }
 0x3c2   : > { %v1613_v16 = vsel %vm1395_vm3, %v3594_v11, 0.0 }
 0x3c3   : > { %v1128_v17 = vcombine.low %v1103_v12, %v1111_v13  ;;  %v1129_v18 = vcombine.high %v1103_v12, %v1111_v13  ;;  %v1144_v19 = vcombine.low %v1119_v14, %v1127_v15  ;;  %v1145_v20 = vcombine.high %v1119_v14, %v1127_v15  ;;  %1614 = vadd.xlane.f32.xlu1 %v1613_v16 }
 0x3c5   : > { %v1136_v21 = vrot.slane %v1128_v17, %v3509_v38  ;;  %v1143_v22 = vrot.slane %v1129_v18, %v3509_v38  ;;  %v1152_v23 = vrot.slane %v1144_v19, %v3509_v38  ;;  %v1159_v24 = vrot.slane %v1145_v20, %v3509_v38 }
 0x3c7   : > { %v1160_v25 = vcombine.low %v1136_v21, %v1152_v23  ;;  %v1161_v26 = vcombine.high %v1136_v21, %v1152_v23  ;;  %v1162_v27 = vcombine.low %v1143_v22, %v1159_v24  ;;  %v1163_v28 = vcombine.high %v1143_v22, %v1159_v24 }
 0x3c9   : > { %v1164_v29 = vpack.c.bf16 %v1160_v25, %v1160_v25  ;;  %v1165_v30 = vpack.c.bf16 %v1161_v26, %v1161_v26  ;;  %v1166_v31 = vpack.c.bf16 %v1162_v27, %v1162_v27  ;;  %v1167_v33 = vpack.c.bf16 %v1163_v28, %v1163_v28  ;;  %v2796_v25 = vld [vmem:[#allocation10] sm:$0xff]  }
 0x3cb   : > { %1168 = vst.msk [vmem:[#allocation3] sm:$0xf] %vm1013_vm2, %v1164_v29  ;;  %1169 = vst.msk [vmem:[#allocation3 + $0x4] sm:$0xf] %vm1013_vm2, %v1165_v30 }
 0x3cc   : > { %1170 = vst.msk [vmem:[#allocation3 + $0x8] sm:$0xf] %vm1013_vm2, %v1166_v31  ;;  %1171 = vst.msk [vmem:[#allocation3 + $0xc] sm:$0xf] %vm1013_vm2, %v1167_v33 }
 0x3d2   : > { %v1633_v34 = vld [vmem:[#allocation3] sm:$0xf]  ;;  %v1634_v35 = vld [vmem:[#allocation3 + $0x4] sm:$0xf] }
 0x3d3   : > { %v1642_v36 = vsel %vm1640_vm4, %v1633_v34, 0  ;;  %v1688_v37 = vsel %vm1640_vm4, %v1634_v35, 0  ;;  %v1635_v48 = vld [vmem:[#allocation3 + $0x8] sm:$0xf]  ;;  %v1636_v51 = vld [vmem:[#allocation3 + $0xc] sm:$0xf] }
 0x3d4   : > { %2617 = vmatpush3.bf16.msra.mxu1 %v1642_v36  ;;  %2623 = vmatpush3.bf16.msra.mxu0 %v1688_v37  ;;  %v1734_v53 = vsel %vm1640_vm4, %v1635_v48, 0  ;;  %v2797_v35 = vld [vmem:[#allocation10 + $0x8] sm:$0xff]  }
 0x3d5   : > { %2628 = vmatprep.subr.bf16.mxu1 %v3097_v0  ;;  %2634 = vmatprep.subr.bf16.mxu0 %v3097_v0 }
 0x444   : > { %v1606_v39 = vpop.xlane.xlu1 %1605 }
 0x445   : > { %2812 = vrcp.f32 %v1606_v39  ;;  %v1609_v40 = vpop.xlane.xlu0 %1608 }
 0x446   : > { %2814 = vrcp.f32 %v1609_v40 }
 0x44c   : > { %v1612_v41 = vpop.xlane.xlu0 %1611 }
 0x44d   : > { %2816 = vrcp.f32 %v1612_v41 }
 0x44f   : > { %v2813_v42 = vpop.eup %2812 }
 0x450   : > { %v2815_v43 = vpop.eup %2814  ;;  %v1620_v44 = vmul.f32 %v2813_v42, %v3574_v45  ;;  %v1615_v46 = vpop.xlane.xlu1 %1614  ;;  %v1780_v45 = vsel %vm1640_vm4, %v1636_v51, 0 }
 0x451   : > { %v1621_v47 = vmul.f32 %v2815_v43, %v3576_v49  ;;  %2818 = vrcp.f32 %v1615_v46 }
 0x452   : > { %v1624_v50 = vpack.c.bf16 %v1620_v44, %v1620_v44 }
 0x453   : > { %v1625_v52 = vpack.c.bf16 %v1621_v47, %v1621_v47 }
 0x454   : > { %1629 = vst.msk [vmem:[%s3617_s10] sm:$0xf] %vm1013_vm2, %v1624_v50  ;;  %2619 = vmatmul.mubr.msk.bf16.vlgmr.msra.gmra.mrb[12].mxu1 %vm1395_vm3, %v1624_v50 }
 0x455   : > { %1630 = vst.msk [vmem:[%s3617_s10 + $0x4] sm:$0xf] %vm1013_vm2, %v1625_v52  ;;  %2625 = vmatmul.mubr.msk.bf16.vlgmr.msra.gmra.mrb[16].mxu0 %vm1395_vm3, %v1625_v52  ;;  %2629 = vmatpush3.bf16.msra.mxu1 %v1734_v53 }
 0x456   : > { %2635 = vmatpush3.bf16.msra.mxu0 %v1780_v45  ;;  %2630 = vmatprep.mubr.msk.bf16.mxu1 %vm3098_vm0, %v3097_v0 }
 0x457   : > { %v2817_v49 = vpop.eup %2816  ;;  %2636 = vmatprep.mubr.msk.bf16.mxu0 %vm3098_vm0, %v3097_v0  ;;  %2640 = vmatprep.subr.bf16.mxu1 %v3097_v0 }
 0x458   : > { %v1622_v54 = vmul.f32 %v2817_v49, %v3586_v63  ;;  %2648 = vmatprep.subr.bf16.mxu0 %v3097_v0 }
 0x45a   : > { %v1626_v55 = vpack.c.bf16 %v1622_v54, %v1622_v54 }
 0x45b   : > { %v2819_v56 = vpop.eup %2818 }
 0x45c   : > { %v1623_v57 = vmul.f32 %v2819_v56, %v3594_v11  ;;  %1631 = vst.msk [vmem:[%s3617_s10 + $0x8] sm:$0xf] %vm1013_vm2, %v1626_v55  ;;  %2631 = vmatmul.mubr.msk.bf16.vlgmr.msra.gmra.mrb[16].mxu1 %vm1395_vm3, %v1626_v55 }
 0x45d   : > { %2644 = vmatprep.mubr.msk.bf16.mxu1 %vm3098_vm0, %v3097_v0  ;;  %2641 = vmatpush3.bf16.msra.mxu1 %v2796_v25 }
 0x45e   : > { %v1627_v58 = vpack.c.bf16 %v1623_v57, %v1623_v57  ;;  %2642 = vmatprep.subr.bf16.mxu1 %v3097_v0 }
 0x460   : > { %1632 = vst.msk [vmem:[%s3617_s10 + $0xc] sm:$0xf] %vm1013_vm2, %v1627_v58  ;;  %2637 = vmatmul.mubr.msk.bf16.vlgmr.msra.gmra.mrb[20].mxu0 %vm1395_vm3, %v1627_v58  ;;  %v2506_v58 = vld [vmem:[#allocation12] ss:$0 sm:$0xff] }
 0x461   : > { %2652 = vmatprep.mubr.msk.bf16.mxu0 %vm3098_vm0, %v3097_v0  ;;  %2643 = vmatpush3.bf16.msra.mxu1 %v2797_v35 }
 0x462   : > { %2656 = vmatprep.subr.bf16.mxu1 %v3097_v0 }
 0x527   : > { %v1678_v59 = vpop.f32.mrb[12].mxu1 }
 0x528   : > { %v1724_v60 = vpop.f32.mrb[16].mxu0  ;;  %v2620_v61 = vpop.f32.mrb[13].mxu1 }
 0x529   : > { %v2626_v62 = vpop.f32.mrb[17].mxu0  ;;  %v1681_v63 = vpop.f32.mrb[14].mxu1 }
 0x52a   : > { %v1727_v1 = vpop.f32.mrb[18].mxu0  ;;  %v2621_v2 = vpop.f32.mrb[15].mxu1 }
 0x52b   : > { %v2627_v3 = vpop.f32.mrb[19].mxu0 }
 0x52f   : > { %v1770_v4 = vpop.f32.mrb[16].mxu1 }
 0x530   : > { %v1822_v5 = vcombine.low %v1678_v59, %v1770_v4  ;;  %v1823_v7 = vcombine.high %v1678_v59, %v1770_v4  ;;  %v2632_v8 = vpop.f32.mrb[17].mxu1 }
 0x531   : > { %v1773_v9 = vpop.f32.mrb[18].mxu1 }
 0x532   : > { %v2633_v10 = vpop.f32.mrb[19].mxu1  ;;  %v1830_v16 = vrot.slane %v1822_v5, %v3507_v32  ;;  %v1837_v17 = vrot.slane %v1823_v7, %v3507_v32  ;;  %v2798_v9 = vld [vmem:[%s3813_s12] sm:$0xff]  }
 0x533   : > { %v1816_v11 = vpop.f32.mrb[20].mxu0  ;;  %2649 = vmatpush3.bf16.msra.mxu0 %v2798_v9  ;;  %v2799_v10 = vld [vmem:[%s3813_s12 + $0x8] sm:$0xff]  }
 0x534   : > { %v1838_v12 = vcombine.low %v1724_v60, %v1816_v11  ;;  %v1839_v13 = vcombine.high %v1724_v60, %v1816_v11  ;;  %v2638_v14 = vpop.f32.mrb[21].mxu0  ;;  %2650 = vmatprep.subr.bf16.mxu0 %v3097_v0  ;;  %v2801_v11 = vld [vmem:[%s3871_s29 + $0x8] sm:$0xff]  }
 0x535   : > { %v1819_v15 = vpop.f32.mrb[22].mxu0 }
 0x536   : > { %v1846_v18 = vrot.slane %v1838_v12, %v3507_v32  ;;  %v1853_v19 = vrot.slane %v1839_v13, %v3507_v32  ;;  %v2639_v20 = vpop.f32.mrb[23].mxu0 }
 0x537   : > { %2651 = vmatpush3.bf16.msra.mxu0 %v2799_v10 }
 0x538   : > { %v1854_v21 = vcombine.low %v1830_v16, %v1846_v18  ;;  %v1855_v22 = vcombine.high %v1830_v16, %v1846_v18  ;;  %v1870_v23 = vcombine.low %v1837_v17, %v1853_v19  ;;  %v1871_v24 = vcombine.high %v1837_v17, %v1853_v19  ;;  %v2511_v18 = vld [vmem:[%s3873_s23] ss:$0 sm:$0xff]  ;;  %s2531_s23 = sshll.u32 %s3080_s21, 8 }
 0x539   : > { %s3712_s2 = scalar_lea.hbm %s3876_s16, %s2531_s23 }
 0x53a   : > { %v1862_v26 = vrot.slane %v1854_v21, %v3509_v38  ;;  %v1869_v27 = vrot.slane %v1855_v22, %v3509_v38  ;;  %v1878_v28 = vrot.slane %v1870_v23, %v3509_v38  ;;  %v1885_v29 = vrot.slane %v1871_v24, %v3509_v38  ;;  %v2802_v22 = vld [vmem:[%s3871_s29 + $0x10] sm:$0xff]   ;;  %v2803_v23 = vld [vmem:[%s3871_s29 + $0x18] sm:$0xff]  }
 0x53c   : > { %v1890_v30 = vcombine.low %v1862_v26, %v1869_v27  ;;  %v2504_v31 = vcombine.high %v1862_v26, %v1869_v27  ;;  %v1906_v33 = vcombine.low %v1878_v28, %v1885_v29  ;;  %v2505_v34 = vcombine.high %v1878_v28, %v1885_v29 }
 0x53e   : > { %v1897_v36 = vrot.slane %v1890_v30, %v3507_v32  ;;  %v1905_v37 = vrot.slane %v2504_v31, %v3507_v32  ;;  %v1913_v39 = vrot.slane %v1906_v33, %v3507_v32  ;;  %v1921_v40 = vrot.slane %v2505_v34, %v3507_v32 }
 0x540   : > { %v1923_v41 = vcombine.high %v1897_v36, %v1905_v37  ;;  %v1939_v42 = vcombine.high %v1913_v39, %v1921_v40  ;;  %v1922_v43 = vcombine.low %v1897_v36, %v1905_v37  ;;  %v1938_v44 = vcombine.low %v1913_v39, %v1921_v40 }
 0x542   : > { %v1937_v46 = vrot.slane %v1923_v41, %v3509_v38  ;;  %v1953_v47 = vrot.slane %v1939_v42, %v3509_v38  ;;  %v1930_v48 = vrot.slane %v1922_v43, %v3509_v38  ;;  %v1946_v50 = vrot.slane %v1938_v44, %v3509_v38 }
 0x544   : > { %v1956_v51 = vcombine.low %v1937_v46, %v1953_v47  ;;  %v1955_v52 = vcombine.high %v1930_v48, %v1946_v50  ;;  %v1957_v53 = vcombine.high %v1937_v46, %v1953_v47  ;;  %v1954_v45 = vcombine.low %v1930_v48, %v1946_v50 }
 0x546   : > { %1963 = vrot.lane.b32.xlu1 %v1956_v51, %s3104_s3  ;;  %1959 = vrot.lane.b32.xlu0 %v1955_v52, %s3105_s24  ;;  %s3874_s24 = sld [smem:[#allocation32_spill]]  ;;  %s2262_s3 = scalar_lea.sflag [#allocation15], %s3437_s7 }
 0x54a   : > { %1967 = vrot.lane.b32.xlu1 %v1957_v53, %s3106_s14  ;;  %s3872_s14 = sld [smem:[#allocation30_spill]] }
 0x54c   : > { %v2512_v24 = vld [vmem:[%s3874_s24] ss:$0 sm:$0xff]  ;;  %s2966_s24 = scalar_lea.vmem %s3714_s11, 256 }
 0x54d   : > { %p2967_p9 = scmp.ne.s32.totalorder %s3714_s11, %s2966_s24 }
 0x54f   : > { %p2968_p11 = pnand %p2967_p9, %p3877_p10 }
 0x550   : > { %v2510_v16 = vld [vmem:[%s3872_s14] ss:$0 sm:$0xff]  ;;  %s3107_s14 = smov [#allocation14]  }
 0x551   : > { %p2969_p0 = pneg %p2968_p11  ;;  %s2970_s28 = sshll.u32 %s3107_s14, 4  ;;  %s2971_s28 = int_to_ptr.vmem [resolvable:$false] %s2970_s28 }
 0x552   : > { %s2972_s10 = scalar_lea.vmem %s2971_s28, 512  ;;  %p2973_p7 = scmp.lt.s32.totalorder %s3714_s11, %s2971_s28 }
 0x553   : > { %p2974_p5 = scmp.lt.s32.totalorder %s2972_s10, %s2966_s24 }
 0x555   : > { %p2975_p8 = por %p2974_p5, %p2973_p7 }
 0x557   : > { %p2976_p1 = pnand %p2975_p8, %p2969_p0 }
 0x5b8   : > { %v1964_v32 = vpop.permute.xlu1 %1963  ;;  %v1960_v49 = vpop.permute.xlu0 %1959 }
 0x5b9   : > { %v1970_v54 = vsel %vm1395_vm3, %v1954_v45, %v1960_v49 }
 0x5ba   : > { %v1972_v56 = vsel %vm1971_vm5, %v1970_v54, %v1964_v32 }
 0x5bc   : > { %v1968_v55 = vpop.permute.xlu1 %1967 }
 0x5bd   : > { %v1974_v57 = vsel %vm1973_vm6, %v1972_v56, %v1968_v55 }
 0x5be   : > { %v1975_v38 = vpack.c.bf16 %v1974_v57, %v1974_v57 }
 0x5c0   : > { %2645 = vmatmul.mubr.msk.bf16.vlgmr.msra.gmra.mrb[20].mxu1 %vm756_vm1, %v1975_v38 }
 0x5c1   : > { %2664 = vmatprep.mubr.msk.bf16.mxu1 %vm3098_vm0, %v3097_v0 }
 0x693   : > { %v2036_v59 = vpop.f32.mrb[20].mxu1 }
 0x694   : > { %v2037_v60 = vadd.f32 %v2506_v58, %v2036_v59  ;;  %v2646_v61 = vpop.f32.mrb[21].mxu1 }
 0x695   : > { %v2039_v62 = vpop.f32.mrb[22].mxu1 }
 0x696   : > { %v2647_v63 = vpop.f32.mrb[23].mxu1  ;;  %v2042_v1 = vadd.f32 %v2037_v60, %v3478_v6  ;;  %v2800_v6 = vld [vmem:[%s3871_s29] sm:$0xff]  }
 0x697   : > { %2657 = vmatpush3.bf16.msra.mxu1 %v2800_v6 }
 0x698   : > { %v2043_v2 = vsel %vm756_vm1, %v2042_v1, 0.0  ;;  %2658 = vmatprep.subr.bf16.mxu1 %v3097_v0 }
 0x699   : > { %2044 = vadd.xlane.f32.xlu0 %v2043_v2 }
 0x69b   : > { %2659 = vmatpush3.bf16.msra.mxu1 %v2801_v11 }
 0x69c   : > { %2660 = vmatprep.subr.bf16.mxu1 %v3097_v0 }
 0x69f   : > { %2661 = vmatpush3.bf16.msra.mxu1 %v2802_v22 }
 0x6a0   : > { %2662 = vmatprep.subr.bf16.mxu1 %v3097_v0  ;;  %v2516_v0 = vld [vmem:[%s3875_s6] ss:$0 sm:$0xff] }
 0x6a3   : > { %2663 = vmatpush3.bf16.msra.mxu1 %v2803_v23 }
 0x726   : > { %v2045_v3 = vpop.xlane.xlu0 %2044 }
 0x727   : > { %v2047_v4 = vmul.f32 0.03125, %v2045_v3 }
 0x729   : > { %v2048_v5 = vsub.f32 %v2042_v1, %v2047_v4 }
 0x72b   : > { %v2049_v7 = vmul.f32 %v2048_v5, %v2048_v5 }
 0x72d   : > { %v2050_v8 = vsel %vm756_vm1, %v2049_v7, 0.0 }
 0x72e   : > { %2051 = vadd.xlane.f32.xlu1 %v2050_v8 }
 0x7bb   : > { %v2052_v12 = vpop.xlane.xlu1 %2051 }
 0x7bc   : > { %v2053_v13 = vmul.f32 0.03125, %v2052_v12 }
 0x7be   : > { %v2054_v14 = vadd.f32 1e-05, %v2053_v13 }
 0x7c0   : > { %2820 = vrsqrt.f32 %v2054_v14 }
 0x7ca   : > { %v2821_v15 = vpop.eup %2820 }
 0x7cb   : > { %v2056_v17 = vmul.f32 %v2821_v15, %v2048_v5 }
 0x7cd   : > { %v2064_v19 = vmul.f32 %v2510_v16, %v2056_v17 }
 0x7cf   : > { %v2072_v20 = vadd.f32 %v2511_v18, %v2064_v19 }
 0x7d1   : > { %v2073_v21 = vpack.c.bf16 %v2072_v20, %v2072_v20 }
 0x7d3   : > { %2653 = vmatmul.mubr.msk.bf16.vlgmr.msra.gmra.mrb[24].mxu0 %vm756_vm1, %v2073_v21 }
 0x8a6   : > { %v2134_v25 = vpop.f32.mrb[24].mxu0 }
 0x8a7   : > { %v2135_v26 = vadd.f32 %v2512_v24, %v2134_v25  ;;  %v2654_v27 = vpop.f32.mrb[25].mxu0 }
 0x8a8   : > { %v2137_v28 = vpop.f32.mrb[26].mxu0 }
 0x8a9   : > { %v2140_v29 = vmax.f32 %v2135_v26, 0.0  ;;  %v2655_v30 = vpop.f32.mrb[27].mxu0 }
 0x8ab   : > { %v2141_v31 = vpack.c.bf16 %v2140_v29, %v2140_v29 }
 0x8ad   : > { %2665 = vmatmul.mubr.msk.bf16.vlgmr.msra.gmra.mrb[24].mxu1 %vm2181_vm7, %v2141_v31 }
 0x980   : > { %v2219_v33 = vpop.f32.mrb[24].mxu1 }
 0x981   : > { %v2220_v34 = vadd.f32 %v2516_v0, %v2219_v33  ;;  %v2666_v35 = vpop.f32.mrb[25].mxu1 }
 0x982   : > { %v2222_v36 = vpop.f32.mrb[26].mxu1 }
 0x983   : > { %v2667_v37 = vpop.f32.mrb[27].mxu1  ;;  %v2225_v39 = vadd.f32 %v2220_v34, %v2072_v20 }
 0x985   : > { %v2226_v40 = vsel %vm756_vm1, %v2225_v39, 0.0 }
 0x986   : > { %2227 = vadd.xlane.f32.xlu0 %v2226_v40 }
 0xa13   : > { %v2228_v41 = vpop.xlane.xlu0 %2227 }
 0xa14   : > { %v2229_v42 = vmul.f32 0.03125, %v2228_v41 }
 0xa16   : > { %v2230_v43 = vsub.f32 %v2225_v39, %v2229_v42 }
 0xa18   : > { %v2231_v44 = vmul.f32 %v2230_v43, %v2230_v43 }
 0xa1a   : > { %v2232_v46 = vsel %vm756_vm1, %v2231_v44, 0.0 }
 0xa1b   : > { %2233 = vadd.xlane.f32.xlu0 %v2232_v46 }
 0xa1c   : > { %2979 = shalt.err (!%p2976_p1)
}
 0xa1d   : > { %s2980_s6 = scalar_lea.hbm %s3712_s2, 256  ;;  %s2984_s13 = scalar_lea.hbm %s3876_s16, 512 }
 0xa1e   : > { %p2981_p3 = scmp.ne.s32.totalorder %s3712_s2, %s2980_s6  ;;  %p2985_p12 = scmp.lt.u32.totalorder %s3712_s2, %s3876_s16 }
 0xa1f   : > { %p2986_p4 = scmp.lt.u32.totalorder %s2984_s13, %s2980_s6  ;;  %p2988_p9 = scmp.lt.u32.totalorder %s2980_s6, %s3712_s2 }
 0xa20   : > { %p2982_p6 = pnand %p2981_p3, %p3877_p10 }
 0xa21   : > { %p2987_p2 = por %p2986_p4, %p2985_p12 }
 0xa22   : > { %p2983_p13 = pneg %p2982_p6 }
 0xa23   : > { %p2989_p11 = por %p2988_p9, %p2987_p2 }
 0xa25   : > { %p2990_p0 = pnand %p2989_p11, %p2983_p13 }
 0xa27   : > { %2993 = shalt.err (!%p2990_p0)
}
 0xa28   : > { %s3108_s24 = smov 64   ;;  %s3109_s10 = smov 4  }
 0xa29   : > { %2687 = dma.vmem_to_hbm [thread:$0]  (%p3877_p10), %s3714_s11, 256, %s3712_s2, %s2262_s3, %s3108_s24, %s3108_s24, %s3109_s10  }
 0xa2a   : > { %s2475_s6 = sshll.u32 %s3437_s7, 3  ;;  %s3878_s13 = sld [smem:[#allocation35_spill]] }
 0xa2b   : > { %s3879_s4 = sld [smem:[#allocation36_spill]]  ;;  %s2526_s5 = sshll.u32 %s3080_s21, 7 }
 0xa2c   : > { %s712_s8 = scalar_lea.vmem [#allocation13], %s2475_s6  ;;  %s3880_s24 = sld [smem:[#allocation37_spill]] }
 0xa2d   : > { %s2276_s11 = sshll.u32 %s712_s8, 4  ;;  %s2257_s23 = scalar_lea.sflag [#allocation6], %s3437_s7  ;;  %s3753_s11 = int_to_ptr.vmem [resolvable:$true] %s2276_s11 }
 0xa2e   : > { %s2994_s26 = scalar_lea.vmem %s3753_s11, 128 }
 0xa2f   : > { %p2995_p7 = scmp.ne.s32.totalorder %s3753_s11, %s2994_s26 }
 0xa30   : > { %v2522_v52 = vld [vmem:[%s3878_s13] ss:$0 sm:$0xff] }
 0xa31   : > { %v2523_v45 = vld [vmem:[%s3879_s4] ss:$0 sm:$0xff]  ;;  %p2996_p5 = pnand %p2995_p7, %p3877_p10  ;;  %s3110_s4 = smov [#allocation13]  }
 0xa32   : > { %s3751_s10 = scalar_lea.hbm %s3880_s24, %s2526_s5  ;;  %s2998_s21 = sshll.u32 %s3110_s4, 4  ;;  %s2999_s21 = int_to_ptr.vmem [resolvable:$false] %s2998_s21 }
 0xa33   : > { %p2997_p8 = pneg %p2996_p5  ;;  %s3000_s6 = scalar_lea.vmem %s2999_s21, 256 }
 0xa34   : > { %p3001_p1 = scmp.lt.s32.totalorder %s3753_s11, %s2999_s21  ;;  %p3002_p3 = scmp.lt.s32.totalorder %s3000_s6, %s2994_s26 }
 0xa36   : > { %p3003_p6 = por %p3002_p3, %p3001_p1 }
 0xa38   : > { %p3004_p13 = pnand %p3003_p6, %p2997_p8 }
 0xaa8   : > { %v2234_v47 = vpop.xlane.xlu0 %2233 }
 0xaa9   : > { %v2235_v48 = vmul.f32 0.03125, %v2234_v47 }
 0xaab   : > { %v2236_v50 = vadd.f32 1e-05, %v2235_v48 }
 0xaad   : > { %2822 = vrsqrt.f32 %v2236_v50 }
 0xab7   : > { %v2823_v51 = vpop.eup %2822 }
 0xab8   : > { %v2238_v53 = vmul.f32 %v2823_v51, %v2230_v43 }
 0xaba   : > { %v2246_v32 = vmul.f32 %v2522_v52, %v2238_v53 }
 0xabc   : > { %v2254_v49 = vadd.f32 %v2523_v45, %v2246_v32 }
 0xabe   : > { %2255 = vst.msk [vmem:[%s712_s8] sm:$0xff] %vm756_vm1, %v2254_v49 }
 0xabf   : > { %3007 = shalt.err (!%p3004_p13)
}
 0xac0   : > { %s3008_s5 = scalar_lea.hbm %s3751_s10, 128  ;;  %s3012_s13 = scalar_lea.hbm %s3880_s24, 256 }
 0xac1   : > { %p3009_p12 = scmp.ne.s32.totalorder %s3751_s10, %s3008_s5  ;;  %p3013_p9 = scmp.lt.u32.totalorder %s3751_s10, %s3880_s24 }
 0xac2   : > { %p3014_p11 = scmp.lt.u32.totalorder %s3012_s13, %s3008_s5  ;;  %p3016_p7 = scmp.lt.u32.totalorder %s3008_s5, %s3751_s10 }
 0xac3   : > { %p3010_p4 = pnand %p3009_p12, %p3877_p10 }
 0xac4   : > { %p3015_p0 = por %p3014_p11, %p3013_p9 }
 0xac5   : > { %p3011_p2 = pneg %p3010_p4 }
 0xac6   : > { %p3017_p5 = por %p3016_p7, %p3015_p0 }
 0xac8   : > { %p3018_p8 = pnand %p3017_p5, %p3011_p2 }
 0xaca   : > { %3021 = shalt.err (!%p3018_p8)
}
 0xacb   : > { %2686 = dma.vmem_to_hbm [thread:$0]  (%p3877_p10), %s3753_s11, 128, %s3751_s10, %s2257_s23  }
 0xacc PF: > { %s2305_s2 = sand.u32 1, %s3068_s0   ;;  %p3881_p1 = scmp.ne.s32.totalorder %s3861_s27, 0 }
 0xacd   : > { %p3882_p3 = scmp.ge.s32.totalorder %s3088_s22, 2  ;;  %s2306_s3 = scalar_lea.sflag [#allocation6], %s2305_s2 }
 0xacf   : > { %p2708_p6 = pnand %p3882_p3, %p3881_p1 }
 0xad1   : > { %3059 = dma.done.wait (!%p2708_p6), %s2306_s3, 128  }
 0xad2   : > { %3061 = vsyncadd (!%p2708_p6), %s2306_s3, 4294967168  ;;  %s2315_s26 = scalar_lea.sflag [#allocation15], %s2305_s2 }
 0xad3   : > { %3063 = dma.done.wait (!%p2708_p6), %s2315_s26, 256  }
 0xad4   : > { %3065 = vsyncadd (!%p2708_p6), %s2315_s26, 4294967040  ;;  %s41_s22 = sadd.s32 1, %s3088_s22   ;;  %s3883_s0 = smov %s3072_s30 }
 0xad5   : > { %p38_p13 = scmp.ge.s32.totalorder %s41_s22, 4   ;;  %s3884_s30 = smov %s3076_s20 }
 0xad6   : > { %s3885_s20 = smov %s3387_s25  ;;  %s3886_s21 = smov %s3084_s1 }
 0xad7   : > { %s3887_s1 = smov %s3889_s17  ;;  %40 = sbr.rel (!%p38_p13) target bundleno = 29 (0x1d), region = 177 }
 0xade   :  { %2320 = vsyncpa [#allocation5], 1 }
 0xadf   :  { %2322 = vsyncpa [#allocation5 + $0x1], 1 }
 0xae0   :  { %2323 = vsyncpa [#allocation8], 1 }
 0xae1   :  { %2324 = vsyncpa [#allocation11], 1 }
 0xae2   :  { %2325 = vsyncpa [#allocation6], 1 }
 0xae3   :  { %2327 = vsyncpa [#allocation6 + $0x1], 1 }
 0xae4   :  { %2328 = vsyncpa [#allocation15], 1 }
 0xae5   :  { %2330 = vsyncpa [#allocation15 + $0x1], 1 }

</bundles_post_ra>
